<compile_context>
chip_gen: v7x
topology: tpu7x:2x2x1
jax: 0.10.0
libtpu: 0.0.40
codegen_flags: <defaults>
</compile_context>

<pallas_src>
import jax
import jax.numpy as jnp
from jax import lax
from jax.experimental import pallas as pl
from jax.experimental.pallas import tpu as pltpu


def _fit_tile(dim, target):
    """Largest tile <= target that divides dim (falls back to the full dim)."""
    t = min(target, dim)
    if dim % t == 0:
        return t
    return dim


# -------------------- shared tiled  "x @ W + b"  kernel ----------------------
def _matmul_bias_kernel(x_ref, w_ref, b_ref, o_ref):
    o_ref[...] = (jnp.dot(x_ref[...], w_ref[...],
                          preferred_element_type=jnp.float32) + b_ref[...])


# ---------------- input-gate projection (both directions at once) ------------
def input_proj_pallas(x2d, w_stack, b_stack, *, row_tile=256):
    """x2d: (N, Hin); w_stack: (2, Hin, G); b_stack: (2, 1, G) -> (2, N, G)."""
    N, Hin = x2d.shape
    G = w_stack.shape[-1]
    tm = _fit_tile(N, row_tile)
    return pl.pallas_call(
        _matmul_bias_kernel,
        out_shape=jax.ShapeDtypeStruct((2, N, G), jnp.float32),
        grid_spec=pltpu.PrefetchScalarGridSpec(
            num_scalar_prefetch=0,
            grid=(2, N // tm),
            in_specs=[
                pl.BlockSpec((tm, Hin), lambda d, i: (i, 0)),        # X rows
                pl.BlockSpec((None, Hin, G), lambda d, i: (d, 0, 0)),  # W_ih^T (per dir)
                pl.BlockSpec((None, 1, G), lambda d, i: (d, 0, 0)),    # b_ih+b_hh (per dir)
            ],
            out_specs=pl.BlockSpec((None, tm, G), lambda d, i: (d, i, 0)),
        ),
        compiler_params=pltpu.CompilerParams(
            dimension_semantics=("parallel", "parallel")),
    )(x2d, w_stack, b_stack)


# ------------------- bi-directional LSTM recurrence kernel -------------------
def _make_bilstm_kernel(S, H, unroll):
    def kernel(gx_ref, whh_ref, out_ref, h_scr, c_scr):
        d = pl.program_id(0)                    # 0: forward in time, 1: backward
        h_scr[...] = jnp.zeros_like(h_scr)
        c_scr[...] = jnp.zeros_like(c_scr)
        whh = whh_ref[...]                      # (H, 4H), loaded once

        def step(i, carry):
            # backward direction walks t = S-1 .. 0, writing back in place so the
            # output is already "un-flipped" (== torch.flip(lstm(flip(x)), 1)).
            t = jnp.where(d == 0, i, S - 1 - i)
            # only h @ W_hh remains on the serial path; X @ W_ih + b is precomputed.
            gates = gx_ref[t] + jnp.dot(h_scr[...], whh,
                                        preferred_element_type=jnp.float32)
            # PyTorch gate order: i, f, g, o
            ig = jax.nn.sigmoid(gates[:, 0 * H:1 * H])
            fg = jax.nn.sigmoid(gates[:, 1 * H:2 * H])
            gg = jnp.tanh(gates[:, 2 * H:3 * H])
            og = jax.nn.sigmoid(gates[:, 3 * H:4 * H])
            c = fg * c_scr[...] + ig * gg
            h = og * jnp.tanh(c)
            c_scr[...] = c
            h_scr[...] = h
            out_ref[t] = h
            return carry

        lax.fori_loop(0, S, step, 0, unroll=unroll)

    return kernel


def bilstm_pallas(gx, whh_stack):
    """gx: (2, S, B, 4H) precomputed X@W_ih+b; whh_stack: (2, H, 4H).
    Returns hidden states (2, S, B, H); direction 1 is already un-reversed.
    Note: for production sequence lengths the (S, B, 4H) slab should be
    S-chunked (extra 'arbitrary' grid axis) to respect the VMEM budget
    (64 MiB on v7x); at these sizes a single chunk fits easily."""
    _, S, B, G = gx.shape
    H = whh_stack.shape[1]
    unroll = True if S <= 32 else 8
    return pl.pallas_call(
        _make_bilstm_kernel(S, H, unroll),
        out_shape=jax.ShapeDtypeStruct((2, S, B, H), jnp.float32),
        grid_spec=pltpu.PrefetchScalarGridSpec(
            num_scalar_prefetch=0,
            grid=(2,),
            in_specs=[
                pl.BlockSpec((None, S, B, G), lambda d: (d, 0, 0, 0)),  # gates
                pl.BlockSpec((None, H, G), lambda d: (d, 0, 0)),        # W_hh^T
            ],
            out_specs=pl.BlockSpec((None, S, B, H), lambda d: (d, 0, 0, 0)),
            scratch_shapes=[pltpu.VMEM((B, H), jnp.float32),            # h carry
                            pltpu.VMEM((B, H), jnp.float32)],           # c carry
        ),
        compiler_params=pltpu.CompilerParams(
            dimension_semantics=("parallel",)),   # directions are independent (2 TCs on v7x)
    )(gx, whh_stack)


# ----------------------- score layer (tiled, fused dirs) ---------------------
def linear_pallas(x2d, w, b2d, *, row_tile=256, col_tile=512):
    N, H = x2d.shape
    V = w.shape[1]
    tn = _fit_tile(N, row_tile)
    tv = _fit_tile(V, col_tile)
    return pl.pallas_call(
        _matmul_bias_kernel,
        out_shape=jax.ShapeDtypeStruct((N, V), jnp.float32),
        grid_spec=pltpu.PrefetchScalarGridSpec(
            num_scalar_prefetch=0,
            grid=(N // tn, V // tv),
            in_specs=[
                pl.BlockSpec((tn, H), lambda i, j: (i, 0)),
                pl.BlockSpec((H, tv), lambda i, j: (0, j)),
                pl.BlockSpec((1, tv), lambda i, j: (0, j)),
            ],
            out_specs=pl.BlockSpec((tn, tv), lambda i, j: (i, j)),
        ),
        compiler_params=pltpu.CompilerParams(
            dimension_semantics=("parallel", "parallel")),
    )(x2d, w, b2d)


# ------------------------------ ELMO forward ---------------------------------
def elmo_forward_pretrain(params, ids):
    B, S = ids.shape
    H = params["embedding"].shape[1]
    V = params["w_score"].shape[1]

    # Gather directly in time-major (S, B, H) layout — no activation transpose.
    emb_sb = params["embedding"][ids.T]                  # (S, B, H)
    emb_2d = emb_sb.reshape(S * B, H)                    # free view

    wih = jnp.stack([params["wih_f2"], params["wih_b2"]])   # (2, H, 4H)
    whh = jnp.stack([params["whh_f2"], params["whh_b2"]])   # (2, H, 4H)
    bb = jnp.stack([params["b_f2"], params["b_b2"]])        # (2, 1, 4H)

    # 1) input projection for all timesteps, both directions (one big matmul).
    gx = input_proj_pallas(emb_2d, wih, bb)              # (2, S*B, 4H)
    gx = gx.reshape(2, S, B, 4 * H)                      # free view

    # 2) the serial recurrence, both directions in one call.
    h = bilstm_pallas(gx, whh)                           # (2, S, B, H)

    # 3) score layer, both directions fused into one tiled matmul.
    h2d = h.reshape(2 * S * B, H)                        # free view
    scores = linear_pallas(h2d, params["w_score"], params["b_score"])  # (2SB, V)
    scores = scores.reshape(2, S, B, V).transpose(0, 2, 1, 3)          # (2, B, S, V)
    return scores[0], scores[1]

    # TODO(synk): bf16 weight/activation packing (f32 accumulation) for v6e/v7x
    # MXU is a further ~2x bandwidth/VMEM win; kept f32 here to hold the f32
    # reference tolerance over the recurrence.


# ------------------------------ pure-JAX reference ---------------------------
def _lstm_ref(x_sbh, w_ih, w_hh, b):
    H = w_hh.shape[0]
    B = x_sbh.shape[1]
    hp = jax.lax.Precision.HIGHEST

    def step(carry, x):
        h, c = carry
        gates = (jnp.dot(x, w_ih, precision=hp)
                 + jnp.dot(h, w_hh, precision=hp) + b[0])
        i = jax.nn.sigmoid(gates[:, 0 * H:1 * H])
        f = jax.nn.sigmoid(gates[:, 1 * H:2 * H])
        g = jnp.tanh(gates[:, 2 * H:3 * H])
        o = jax.nn.sigmoid(gates[:, 3 * H:4 * H])
        c = f * c + i * g
        h = o * jnp.tanh(c)
        return (h, c), h

    init = (jnp.zeros((B, H), jnp.float32), jnp.zeros((B, H), jnp.float32))
    _, hs = lax.scan(step, init, x_sbh)
    return hs


def _elmo_ref(params, ids):
    hp = jax.lax.Precision.HIGHEST
    emb = params["embedding"][ids]
    x = jnp.transpose(emb, (1, 0, 2))
    h_for = _lstm_ref(x, params["wih_f2"], params["whh_f2"], params["b_f2"])
    h_back = jnp.flip(
        _lstm_ref(jnp.flip(x, 0), params["wih_b2"], params["whh_b2"], params["b_b2"]), 0)
    sf = jnp.dot(jnp.transpose(h_for, (1, 0, 2)), params["w_score"],
                 precision=hp) + params["b_score"][0]
    sb = jnp.dot(jnp.transpose(h_back, (1, 0, 2)), params["w_score"],
                 precision=hp) + params["b_score"][0]
    return sf, sb


# ------------------------------------ main -----------------------------------
if __name__ == "__main__":
    B, S, H, V = 2, 8, 32, 64       # batch, seq, hidden(=glove_dim), vocab

    key = jax.random.PRNGKey(0)
    ks = jax.random.split(key, 12)
    scale = 1.0 / jnp.sqrt(jnp.float32(H))

    def u(k, shape):
        return jax.random.uniform(k, shape, jnp.float32, -scale, scale)

    params = {
        # Embedding.from_pretrained(glove_embeddings_for_vocab): (V, H)
        "embedding": jax.random.normal(ks[0], (V, H), jnp.float32) * 0.1,
        # lstm_forward_2 (H -> H), weights stored pre-transposed: (H, 4H)
        "wih_f2": u(ks[1], (H, 4 * H)),
        "whh_f2": u(ks[2], (H, 4 * H)),
        "b_f2":   u(ks[3], (1, 4 * H)) + u(ks[4], (1, 4 * H)),   # b_ih + b_hh
        # lstm_backward_2 (H -> glove_dim == H)
        "wih_b2": u(ks[5], (H, 4 * H)),
        "whh_b2": u(ks[6], (H, 4 * H)),
        "b_b2":   u(ks[7], (1, 4 * H)) + u(ks[8], (1, 4 * H)),
        # score_layer: Linear(H, V), stored transposed: (H, V), bias (1, V)
        "w_score": u(ks[9], (H, V)),
        "b_score": u(ks[10], (1, V)),
    }
    # TODO(synk): lstm_forward_1 / lstm_backward_1 and the fine-tune branch
    # (trainable_weights_for_task mix, yelp_classifier) are not exercised by
    # forward() in 'train' mode, so they are omitted here.

    ids = jax.random.randint(ks[11], (B, S), 0, V, dtype=jnp.int32)

    fwd = jax.jit(elmo_forward_pretrain)
    score_for, score_back = fwd(params, ids)
    jax.block_until_ready((score_for, score_back))

    ref_for, ref_back = _elmo_ref(params, ids)
    assert score_for.shape == (B, S, V) and score_back.shape == (B, S, V)
    assert jnp.allclose(score_for, ref_for, rtol=1e-2, atol=1e-2)
    assert jnp.allclose(score_back, ref_back, rtol=1e-2, atol=1e-2)

    print("KERNEL_OK")
</pallas_src>

<mosaic_0001>
module attributes {stable_mosaic.version = 11 : i64} {
  func.func @_matmul_bias_kernel(%arg0: i32, %arg1: i32, %arg2: memref<16x32xf32, #tpu.memory_space<vmem>>, %arg3: memref<1x32x128xf32, #tpu.memory_space<vmem>>, %arg4: memref<1x1x128xf32, #tpu.memory_space<vmem>>, %arg5: memref<1x16x128xf32, #tpu.memory_space<vmem>>) attributes {dimension_semantics = [#tpu.dimension_semantics<parallel>, #tpu.dimension_semantics<parallel>], iteration_bounds = array<i64: 2, 1>, scalar_prefetch = 0 : i64, scratch_operands = 0 : i64, tpu.core_type = #tpu.core_type<tc>, window_params = [{transform_indices = @transform_0, window_bounds = array<i64: 16, 32>}, {transform_indices = @transform_1, window_bounds = array<i64: 1, 32, 128>}, {transform_indices = @transform_2, window_bounds = array<i64: 1, 1, 128>}, {transform_indices = @transform_3, window_bounds = array<i64: 1, 16, 128>}]} {
    %c0 = arith.constant 0 : index
    %c0_0 = arith.constant 0 : index
    %0 = vector.load %arg2[%c0, %c0_0] : memref<16x32xf32, #tpu.memory_space<vmem>>, vector<16x32xf32>
    %c0_1 = arith.constant 0 : index
    %c0_2 = arith.constant 0 : index
    %c0_3 = arith.constant 0 : index
    %1 = vector.load %arg3[%c0_1, %c0_2, %c0_3] : memref<1x32x128xf32, #tpu.memory_space<vmem>>, vector<1x32x128xf32>
    %2 = vector.shape_cast %1 : vector<1x32x128xf32> to vector<32x128xf32>
    %cst = arith.constant dense<0.000000e+00> : vector<16x128xf32>
    %3 = tpu.matmul %0, %2, %cst {dimension_numbers = #tpu.dot_dimension_numbers<[1], [0], [0], [1], [0, 0, 1, 1], [], []>} : vector<16x32xf32>, vector<32x128xf32>, vector<16x128xf32> -> vector<16x128xf32>
    %c0_4 = arith.constant 0 : index
    %c0_5 = arith.constant 0 : index
    %c0_6 = arith.constant 0 : index
    %4 = vector.load %arg4[%c0_4, %c0_5, %c0_6] : memref<1x1x128xf32, #tpu.memory_space<vmem>>, vector<1x1x128xf32>
    %5 = vector.shape_cast %4 : vector<1x1x128xf32> to vector<1x128xf32>
    %6 = vector.broadcast %5 : vector<1x128xf32> to vector<16x128xf32>
    %7 = arith.addf %3, %6 : vector<16x128xf32>
    %c0_7 = arith.constant 0 : index
    %c0_8 = arith.constant 0 : index
    %c0_9 = arith.constant 0 : index
    %8 = vector.load %arg5[%c0_7, %c0_8, %c0_9] : memref<1x16x128xf32, #tpu.memory_space<vmem>>, vector<1x16x128xf32>
    %9 = vector.shape_cast %8 : vector<1x16x128xf32> to vector<16x128xf32>
    %10 = vector.shape_cast %7 : vector<16x128xf32> to vector<1x16x128xf32>
    tpu.vector_store %arg5[%c0_7, %c0_8, %c0_9], %10 {strides = array<i32>} : memref<1x16x128xf32, #tpu.memory_space<vmem>>, vector<1x16x128xf32>,
    return
  }
  func.func @transform_0(%arg0: i32, %arg1: i32) -> (i32, i32) {
    %c0_i32 = arith.constant 0 : i32
    %c0_i32_0 = arith.constant 0 : i32
    return %arg1, %c0_i32 : i32, i32
  }
  func.func @transform_1(%arg0: i32, %arg1: i32) -> (i32, i32, i32) {
    %c0_i32 = arith.constant 0 : i32
    %c0_i32_0 = arith.constant 0 : i32
    %c0_i32_1 = arith.constant 0 : i32
    return %arg0, %c0_i32, %c0_i32_0 : i32, i32, i32
  }
  func.func @transform_2(%arg0: i32, %arg1: i32) -> (i32, i32, i32) {
    %c0_i32 = arith.constant 0 : i32
    %c0_i32_0 = arith.constant 0 : i32
    %c0_i32_1 = arith.constant 0 : i32
    return %arg0, %c0_i32, %c0_i32_0 : i32, i32, i32
  }
  func.func @transform_3(%arg0: i32, %arg1: i32) -> (i32, i32, i32) {
    %c0_i32 = arith.constant 0 : i32
    %c0_i32_0 = arith.constant 0 : i32
    return %arg0, %arg1, %c0_i32 : i32, i32, i32
  }
}

module attributes {stable_mosaic.version = 11 : i64} {
  func.func @_matmul_bias_kernel(%arg0: i32, %arg1: i32, %arg2: memref<32x32xf32, #tpu.memory_space<vmem>>, %arg3: memref<32x64xf32, #tpu.memory_space<vmem>>, %arg4: memref<1x64xf32, #tpu.memory_space<vmem>>, %arg5: memref<32x64xf32, #tpu.memory_space<vmem>>) attributes {dimension_semantics = [#tpu.dimension_semantics<parallel>, #tpu.dimension_semantics<parallel>], iteration_bounds = array<i64: 1, 1>, scalar_prefetch = 0 : i64, scratch_operands = 0 : i64, tpu.core_type = #tpu.core_type<tc>, window_params = [{transform_indices = @transform_0, window_bounds = array<i64: 32, 32>}, {transform_indices = @transform_1, window_bounds = array<i64: 32, 64>}, {transform_indices = @transform_2, window_bounds = array<i64: 1, 64>}, {transform_indices = @transform_3, window_bounds = array<i64: 32, 64>}]} {
    %c0 = arith.constant 0 : index
    %c0_0 = arith.constant 0 : index
    %0 = vector.load %arg2[%c0, %c0_0] : memref<32x32xf32, #tpu.memory_space<vmem>>, vector<32x32xf32>
    %c0_1 = arith.constant 0 : index
    %c0_2 = arith.constant 0 : index
    %1 = vector.load %arg3[%c0_1, %c0_2] : memref<32x64xf32, #tpu.memory_space<vmem>>, vector<32x64xf32>
    %cst = arith.constant dense<0.000000e+00> : vector<32x64xf32>
    %2 = tpu.matmul %0, %1, %cst {dimension_numbers = #tpu.dot_dimension_numbers<[1], [0], [0], [1], [0, 0, 1, 1], [], []>} : vector<32x32xf32>, vector<32x64xf32>, vector<32x64xf32> -> vector<32x64xf32>
    %c0_3 = arith.constant 0 : index
    %c0_4 = arith.constant 0 : index
    %3 = vector.load %arg4[%c0_3, %c0_4] : memref<1x64xf32, #tpu.memory_space<vmem>>, vector<1x64xf32>
    %4 = vector.broadcast %3 : vector<1x64xf32> to vector<32x64xf32>
    %5 = arith.addf %2, %4 : vector<32x64xf32>
    %c0_5 = arith.constant 0 : index
    %c0_6 = arith.constant 0 : index
    %6 = vector.load %arg5[%c0_5, %c0_6] : memref<32x64xf32, #tpu.memory_space<vmem>>, vector<32x64xf32>
    tpu.vector_store %arg5[%c0_5, %c0_6], %5 {strides = array<i32>} : memref<32x64xf32, #tpu.memory_space<vmem>>, vector<32x64xf32>,
    return
  }
  func.func @transform_0(%arg0: i32, %arg1: i32) -> (i32, i32) {
    %c0_i32 = arith.constant 0 : i32
    %c0_i32_0 = arith.constant 0 : i32
    return %arg0, %c0_i32 : i32, i32
  }
  func.func @transform_1(%arg0: i32, %arg1: i32) -> (i32, i32) {
    %c0_i32 = arith.constant 0 : i32
    %c0_i32_0 = arith.constant 0 : i32
    return %c0_i32, %arg1 : i32, i32
  }
  func.func @transform_2(%arg0: i32, %arg1: i32) -> (i32, i32) {
    %c0_i32 = arith.constant 0 : i32
    %c0_i32_0 = arith.constant 0 : i32
    return %c0_i32, %arg1 : i32, i32
  }
  func.func @transform_3(%arg0: i32, %arg1: i32) -> (i32, i32) {
    %c0_i32 = arith.constant 0 : i32
    return %arg0, %arg1 : i32, i32
  }
}

module attributes {stable_mosaic.version = 11 : i64} {
  func.func @kernel(%arg0: i32, %arg1: memref<1x8x2x128xf32, #tpu.memory_space<vmem>>, %arg2: memref<1x32x128xf32, #tpu.memory_space<vmem>>, %arg3: memref<1x8x2x32xf32, #tpu.memory_space<vmem>>, %arg4: memref<2x32xf32, #tpu.memory_space<vmem>>, %arg5: memref<2x32xf32, #tpu.memory_space<vmem>>) attributes {dimension_semantics = [#tpu.dimension_semantics<parallel>], iteration_bounds = array<i64: 2>, scalar_prefetch = 0 : i64, scratch_operands = 2 : i64, tpu.core_type = #tpu.core_type<tc>, window_params = [{transform_indices = @transform_0, window_bounds = array<i64: 1, 8, 2, 128>}, {transform_indices = @transform_1, window_bounds = array<i64: 1, 32, 128>}, {transform_indices = @transform_2, window_bounds = array<i64: 1, 8, 2, 32>}]} {
    %cst = arith.constant 0.000000e+00 : f32
    %0 = vector.broadcast %cst : f32 to vector<2x32xf32>
    %c0 = arith.constant 0 : index
    %c0_0 = arith.constant 0 : index
    %1 = vector.load %arg4[%c0, %c0_0] : memref<2x32xf32, #tpu.memory_space<vmem>>, vector<2x32xf32>
    tpu.vector_store %arg4[%c0, %c0_0], %0 {strides = array<i32>} : memref<2x32xf32, #tpu.memory_space<vmem>>, vector<2x32xf32>,
    %cst_1 = arith.constant 0.000000e+00 : f32
    %2 = vector.broadcast %cst_1 : f32 to vector<2x32xf32>
    %c0_2 = arith.constant 0 : index
    %c0_3 = arith.constant 0 : index
    %3 = vector.load %arg5[%c0_2, %c0_3] : memref<2x32xf32, #tpu.memory_space<vmem>>, vector<2x32xf32>
    tpu.vector_store %arg5[%c0_2, %c0_3], %2 {strides = array<i32>} : memref<2x32xf32, #tpu.memory_space<vmem>>, vector<2x32xf32>,
    %c0_4 = arith.constant 0 : index
    %c0_5 = arith.constant 0 : index
    %c0_6 = arith.constant 0 : index
    %4 = vector.load %arg2[%c0_4, %c0_5, %c0_6] : memref<1x32x128xf32, #tpu.memory_space<vmem>>, vector<1x32x128xf32>
    %5 = vector.shape_cast %4 : vector<1x32x128xf32> to vector<32x128xf32>
    %c0_i32 = arith.constant 0 : i32
    %c0_i32_7 = arith.constant 0 : i32
    %6 = arith.cmpi eq, %arg0, %c0_i32_7 : i32
    %c7_i32 = arith.constant 7 : i32
    %7 = arith.subi %c7_i32, %c0_i32 : i32
    %8 = arith.select %6, %c0_i32, %7 : i32
    %c0_8 = arith.constant 0 : index
    %9 = arith.index_cast %8 : i32 to index
    %c0_9 = arith.constant 0 : index
    %c0_10 = arith.constant 0 : index
    %10 = vector.load %arg1[%c0_8, %9, %c0_9, %c0_10] : memref<1x8x2x128xf32, #tpu.memory_space<vmem>>, vector<1x1x2x128xf32>
    %11 = vector.shape_cast %10 : vector<1x1x2x128xf32> to vector<2x128xf32>
    %c0_11 = arith.constant 0 : index
    %c0_12 = arith.constant 0 : index
    %12 = vector.load %arg4[%c0_11, %c0_12] : memref<2x32xf32, #tpu.memory_space<vmem>>, vector<2x32xf32>
    %cst_13 = arith.constant dense<0.000000e+00> : vector<2x128xf32>
    %13 = tpu.matmul %12, %5, %cst_13 {dimension_numbers = #tpu.dot_dimension_numbers<[1], [0], [0], [1], [0, 0, 1, 1], [], []>} : vector<2x32xf32>, vector<32x128xf32>, vector<2x128xf32> -> vector<2x128xf32>
    %14 = arith.addf %11, %13 : vector<2x128xf32>
    %15 = vector.extract_strided_slice %14 {offsets = [0, 0], sizes = [2, 32], strides = [1, 1]} : vector<2x128xf32> to vector<2x32xf32>
    %16 = arith.negf %15 : vector<2x32xf32>
    %17 = math.exp %16 : vector<2x32xf32>
    %cst_14 = arith.constant 1.000000e+00 : f32
    %18 = vector.broadcast %cst_14 : f32 to vector<2x32xf32>
    %19 = arith.addf %18, %17 : vector<2x32xf32>
    %20 = arith.divf %18, %19 : vector<2x32xf32>
    %21 = vector.extract_strided_slice %14 {offsets = [0, 32], sizes = [2, 32], strides = [1, 1]} : vector<2x128xf32> to vector<2x32xf32>
    %22 = arith.negf %21 : vector<2x32xf32>
    %23 = math.exp %22 : vector<2x32xf32>
    %cst_15 = arith.constant 1.000000e+00 : f32
    %24 = vector.broadcast %cst_15 : f32 to vector<2x32xf32>
    %25 = arith.addf %24, %23 : vector<2x32xf32>
    %26 = arith.divf %24, %25 : vector<2x32xf32>
    %27 = vector.extract_strided_slice %14 {offsets = [0, 64], sizes = [2, 32], strides = [1, 1]} : vector<2x128xf32> to vector<2x32xf32>
    %28 = math.tanh %27 : vector<2x32xf32>
    %29 = vector.extract_strided_slice %14 {offsets = [0, 96], sizes = [2, 32], strides = [1, 1]} : vector<2x128xf32> to vector<2x32xf32>
    %30 = arith.negf %29 : vector<2x32xf32>
    %31 = math.exp %30 : vector<2x32xf32>
    %cst_16 = arith.constant 1.000000e+00 : f32
    %32 = vector.broadcast %cst_16 : f32 to vector<2x32xf32>
    %33 = arith.addf %32, %31 : vector<2x32xf32>
    %34 = arith.divf %32, %33 : vector<2x32xf32>
    %c0_17 = arith.constant 0 : index
    %c0_18 = arith.constant 0 : index
    %35 = vector.load %arg5[%c0_17, %c0_18] : memref<2x32xf32, #tpu.memory_space<vmem>>, vector<2x32xf32>
    %36 = arith.mulf %26, %35 : vector<2x32xf32>
    %37 = arith.mulf %20, %28 : vector<2x32xf32>
    %38 = arith.addf %36, %37 : vector<2x32xf32>
    %39 = math.tanh %38 : vector<2x32xf32>
    %40 = arith.mulf %34, %39 : vector<2x32xf32>
    %c0_19 = arith.constant 0 : index
    %c0_20 = arith.constant 0 : index
    %41 = vector.load %arg5[%c0_19, %c0_20] : memref<2x32xf32, #tpu.memory_space<vmem>>, vector<2x32xf32>
    tpu.vector_store %arg5[%c0_19, %c0_20], %38 {strides = array<i32>} : memref<2x32xf32, #tpu.memory_space<vmem>>, vector<2x32xf32>,
    %c0_21 = arith.constant 0 : index
    %c0_22 = arith.constant 0 : index
    %42 = vector.load %arg4[%c0_21, %c0_22] : memref<2x32xf32, #tpu.memory_space<vmem>>, vector<2x32xf32>
    tpu.vector_store %arg4[%c0_21, %c0_22], %40 {strides = array<i32>} : memref<2x32xf32, #tpu.memory_space<vmem>>, vector<2x32xf32>,
    %c0_23 = arith.constant 0 : index
    %43 = arith.index_cast %8 : i32 to index
    %c0_24 = arith.constant 0 : index
    %c0_25 = arith.constant 0 : index
    %44 = vector.load %arg3[%c0_23, %43, %c0_24, %c0_25] : memref<1x8x2x32xf32, #tpu.memory_space<vmem>>, vector<1x1x2x32xf32>
    %45 = vector.shape_cast %44 : vector<1x1x2x32xf32> to vector<2x32xf32>
    %46 = vector.shape_cast %40 : vector<2x32xf32> to vector<1x1x2x32xf32>
    tpu.vector_store %arg3[%c0_23, %43, %c0_24, %c0_25], %46 {strides = array<i32>} : memref<1x8x2x32xf32, #tpu.memory_space<vmem>>, vector<1x1x2x32xf32>,
    %c1_i32 = arith.constant 1 : i32
    %c0_i32_26 = arith.constant 0 : i32
    %47 = arith.cmpi eq, %arg0, %c0_i32_26 : i32
    %c7_i32_27 = arith.constant 7 : i32
    %48 = arith.subi %c7_i32_27, %c1_i32 : i32
    %49 = arith.select %47, %c1_i32, %48 : i32
    %c0_28 = arith.constant 0 : index
    %50 = arith.index_cast %49 : i32 to index
    %c0_29 = arith.constant 0 : index
    %c0_30 = arith.constant 0 : index
    %51 = vector.load %arg1[%c0_28, %50, %c0_29, %c0_30] : memref<1x8x2x128xf32, #tpu.memory_space<vmem>>, vector<1x1x2x128xf32>
    %52 = vector.shape_cast %51 : vector<1x1x2x128xf32> to vector<2x128xf32>
    %c0_31 = arith.constant 0 : index
    %c0_32 = arith.constant 0 : index
    %53 = vector.load %arg4[%c0_31, %c0_32] : memref<2x32xf32, #tpu.memory_space<vmem>>, vector<2x32xf32>
    %cst_33 = arith.constant dense<0.000000e+00> : vector<2x128xf32>
    %54 = tpu.matmul %53, %5, %cst_33 {dimension_numbers = #tpu.dot_dimension_numbers<[1], [0], [0], [1], [0, 0, 1, 1], [], []>} : vector<2x32xf32>, vector<32x128xf32>, vector<2x128xf32> -> vector<2x128xf32>
    %55 = arith.addf %52, %54 : vector<2x128xf32>
    %56 = vector.extract_strided_slice %55 {offsets = [0, 0], sizes = [2, 32], strides = [1, 1]} : vector<2x128xf32> to vector<2x32xf32>
    %57 = arith.negf %56 : vector<2x32xf32>
    %58 = math.exp %57 : vector<2x32xf32>
    %cst_34 = arith.constant 1.000000e+00 : f32
    %59 = vector.broadcast %cst_34 : f32 to vector<2x32xf32>
    %60 = arith.addf %59, %58 : vector<2x32xf32>
    %61 = arith.divf %59, %60 : vector<2x32xf32>
    %62 = vector.extract_strided_slice %55 {offsets = [0, 32], sizes = [2, 32], strides = [1, 1]} : vector<2x128xf32> to vector<2x32xf32>
    %63 = arith.negf %62 : vector<2x32xf32>
    %64 = math.exp %63 : vector<2x32xf32>
    %cst_35 = arith.constant 1.000000e+00 : f32
    %65 = vector.broadcast %cst_35 : f32 to vector<2x32xf32>
    %66 = arith.addf %65, %64 : vector<2x32xf32>
    %67 = arith.divf %65, %66 : vector<2x32xf32>
    %68 = vector.extract_strided_slice %55 {offsets = [0, 64], sizes = [2, 32], strides = [1, 1]} : vector<2x128xf32> to vector<2x32xf32>
    %69 = math.tanh %68 : vector<2x32xf32>
    %70 = vector.extract_strided_slice %55 {offsets = [0, 96], sizes = [2, 32], strides = [1, 1]} : vector<2x128xf32> to vector<2x32xf32>
    %71 = arith.negf %70 : vector<2x32xf32>
    %72 = math.exp %71 : vector<2x32xf32>
    %cst_36 = arith.constant 1.000000e+00 : f32
    %73 = vector.broadcast %cst_36 : f32 to vector<2x32xf32>
    %74 = arith.addf %73, %72 : vector<2x32xf32>
    %75 = arith.divf %73, %74 : vector<2x32xf32>
    %c0_37 = arith.constant 0 : index
    %c0_38 = arith.constant 0 : index
    %76 = vector.load %arg5[%c0_37, %c0_38] : memref<2x32xf32, #tpu.memory_space<vmem>>, vector<2x32xf32>
    %77 = arith.mulf %67, %76 : vector<2x32xf32>
    %78 = arith.mulf %61, %69 : vector<2x32xf32>
    %79 = arith.addf %77, %78 : vector<2x32xf32>
    %80 = math.tanh %79 : vector<2x32xf32>
    %81 = arith.mulf %75, %80 : vector<2x32xf32>
    %c0_39 = arith.constant 0 : index
    %c0_40 = arith.constant 0 : index
    %82 = vector.load %arg5[%c0_39, %c0_40] : memref<2x32xf32, #tpu.memory_space<vmem>>, vector<2x32xf32>
    tpu.vector_store %arg5[%c0_39, %c0_40], %79 {strides = array<i32>} : memref<2x32xf32, #tpu.memory_space<vmem>>, vector<2x32xf32>,
    %c0_41 = arith.constant 0 : index
    %c0_42 = arith.constant 0 : index
    %83 = vector.load %arg4[%c0_41, %c0_42] : memref<2x32xf32, #tpu.memory_space<vmem>>, vector<2x32xf32>
    tpu.vector_store %arg4[%c0_41, %c0_42], %81 {strides = array<i32>} : memref<2x32xf32, #tpu.memory_space<vmem>>, vector<2x32xf32>,
    %c0_43 = arith.constant 0 : index
    %84 = arith.index_cast %49 : i32 to index
    %c0_44 = arith.constant 0 : index
    %c0_45 = arith.constant 0 : index
    %85 = vector.load %arg3[%c0_43, %84, %c0_44, %c0_45] : memref<1x8x2x32xf32, #tpu.memory_space<vmem>>, vector<1x1x2x32xf32>
    %86 = vector.shape_cast %85 : vector<1x1x2x32xf32> to vector<2x32xf32>
    %87 = vector.shape_cast %81 : vector<2x32xf32> to vector<1x1x2x32xf32>
    tpu.vector_store %arg3[%c0_43, %84, %c0_44, %c0_45], %87 {strides = array<i32>} : memref<1x8x2x32xf32, #tpu.memory_space<vmem>>, vector<1x1x2x32xf32>,
    %c2_i32 = arith.constant 2 : i32
    %c0_i32_46 = arith.constant 0 : i32
    %88 = arith.cmpi eq, %arg0, %c0_i32_46 : i32
    %c7_i32_47 = arith.constant 7 : i32
    %89 = arith.subi %c7_i32_47, %c2_i32 : i32
    %90 = arith.select %88, %c2_i32, %89 : i32
    %c0_48 = arith.constant 0 : index
    %91 = arith.index_cast %90 : i32 to index
    %c0_49 = arith.constant 0 : index
    %c0_50 = arith.constant 0 : index
    %92 = vector.load %arg1[%c0_48, %91, %c0_49, %c0_50] : memref<1x8x2x128xf32, #tpu.memory_space<vmem>>, vector<1x1x2x128xf32>
    %93 = vector.shape_cast %92 : vector<1x1x2x128xf32> to vector<2x128xf32>
    %c0_51 = arith.constant 0 : index
    %c0_52 = arith.constant 0 : index
    %94 = vector.load %arg4[%c0_51, %c0_52] : memref<2x32xf32, #tpu.memory_space<vmem>>, vector<2x32xf32>
    %cst_53 = arith.constant dense<0.000000e+00> : vector<2x128xf32>
    %95 = tpu.matmul %94, %5, %cst_53 {dimension_numbers = #tpu.dot_dimension_numbers<[1], [0], [0], [1], [0, 0, 1, 1], [], []>} : vector<2x32xf32>, vector<32x128xf32>, vector<2x128xf32> -> vector<2x128xf32>
    %96 = arith.addf %93, %95 : vector<2x128xf32>
    %97 = vector.extract_strided_slice %96 {offsets = [0, 0], sizes = [2, 32], strides = [1, 1]} : vector<2x128xf32> to vector<2x32xf32>
    %98 = arith.negf %97 : vector<2x32xf32>
    %99 = math.exp %98 : vector<2x32xf32>
    %cst_54 = arith.constant 1.000000e+00 : f32
    %100 = vector.broadcast %cst_54 : f32 to vector<2x32xf32>
    %101 = arith.addf %100, %99 : vector<2x32xf32>
    %102 = arith.divf %100, %101 : vector<2x32xf32>
    %103 = vector.extract_strided_slice %96 {offsets = [0, 32], sizes = [2, 32], strides = [1, 1]} : vector<2x128xf32> to vector<2x32xf32>
    %104 = arith.negf %103 : vector<2x32xf32>
    %105 = math.exp %104 : vector<2x32xf32>
    %cst_55 = arith.constant 1.000000e+00 : f32
    %106 = vector.broadcast %cst_55 : f32 to vector<2x32xf32>
    %107 = arith.addf %106, %105 : vector<2x32xf32>
    %108 = arith.divf %106, %107 : vector<2x32xf32>
    %109 = vector.extract_strided_slice %96 {offsets = [0, 64], sizes = [2, 32], strides = [1, 1]} : vector<2x128xf32> to vector<2x32xf32>
    %110 = math.tanh %109 : vector<2x32xf32>
    %111 = vector.extract_strided_slice %96 {offsets = [0, 96], sizes = [2, 32], strides = [1, 1]} : vector<2x128xf32> to vector<2x32xf32>
    %112 = arith.negf %111 : vector<2x32xf32>
    %113 = math.exp %112 : vector<2x32xf32>
    %cst_56 = arith.constant 1.000000e+00 : f32
    %114 = vector.broadcast %cst_56 : f32 to vector<2x32xf32>
    %115 = arith.addf %114, %113 : vector<2x32xf32>
    %116 = arith.divf %114, %115 : vector<2x32xf32>
    %c0_57 = arith.constant 0 : index
    %c0_58 = arith.constant 0 : index
    %117 = vector.load %arg5[%c0_57, %c0_58] : memref<2x32xf32, #tpu.memory_space<vmem>>, vector<2x32xf32>
    %118 = arith.mulf %108, %117 : vector<2x32xf32>
    %119 = arith.mulf %102, %110 : vector<2x32xf32>
    %120 = arith.addf %118, %119 : vector<2x32xf32>
    %121 = math.tanh %120 : vector<2x32xf32>
    %122 = arith.mulf %116, %121 : vector<2x32xf32>
    %c0_59 = arith.constant 0 : index
    %c0_60 = arith.constant 0 : index
    %123 = vector.load %arg5[%c0_59, %c0_60] : memref<2x32xf32, #tpu.memory_space<vmem>>, vector<2x32xf32>
    tpu.vector_store %arg5[%c0_59, %c0_60], %120 {strides = array<i32>} : memref<2x32xf32, #tpu.memory_space<vmem>>, vector<2x32xf32>,
    %c0_61 = arith.constant 0 : index
    %c0_62 = arith.constant 0 : index
    %124 = vector.load %arg4[%c0_61, %c0_62] : memref<2x32xf32, #tpu.memory_space<vmem>>, vector<2x32xf32>
    tpu.vector_store %arg4[%c0_61, %c0_62], %122 {strides = array<i32>} : memref<2x32xf32, #tpu.memory_space<vmem>>, vector<2x32xf32>,
    %c0_63 = arith.constant 0 : index
    %125 = arith.index_cast %90 : i32 to index
    %c0_64 = arith.constant 0 : index
    %c0_65 = arith.constant 0 : index
    %126 = vector.load %arg3[%c0_63, %125, %c0_64, %c0_65] : memref<1x8x2x32xf32, #tpu.memory_space<vmem>>, vector<1x1x2x32xf32>
    %127 = vector.shape_cast %126 : vector<1x1x2x32xf32> to vector<2x32xf32>
    %128 = vector.shape_cast %122 : vector<2x32xf32> to vector<1x1x2x32xf32>
    tpu.vector_store %arg3[%c0_63, %125, %c0_64, %c0_65], %128 {strides = array<i32>} : memref<1x8x2x32xf32, #tpu.memory_space<vmem>>, vector<1x1x2x32xf32>,
    %c3_i32 = arith.constant 3 : i32
    %c0_i32_66 = arith.constant 0 : i32
    %129 = arith.cmpi eq, %arg0, %c0_i32_66 : i32
    %c7_i32_67 = arith.constant 7 : i32
    %130 = arith.subi %c7_i32_67, %c3_i32 : i32
    %131 = arith.select %129, %c3_i32, %130 : i32
    %c0_68 = arith.constant 0 : index
    %132 = arith.index_cast %131 : i32 to index
    %c0_69 = arith.constant 0 : index
    %c0_70 = arith.constant 0 : index
    %133 = vector.load %arg1[%c0_68, %132, %c0_69, %c0_70] : memref<1x8x2x128xf32, #tpu.memory_space<vmem>>, vector<1x1x2x128xf32>
    %134 = vector.shape_cast %133 : vector<1x1x2x128xf32> to vector<2x128xf32>
    %c0_71 = arith.constant 0 : index
    %c0_72 = arith.constant 0 : index
    %135 = vector.load %arg4[%c0_71, %c0_72] : memref<2x32xf32, #tpu.memory_space<vmem>>, vector<2x32xf32>
    %cst_73 = arith.constant dense<0.000000e+00> : vector<2x128xf32>
    %136 = tpu.matmul %135, %5, %cst_73 {dimension_numbers = #tpu.dot_dimension_numbers<[1], [0], [0], [1], [0, 0, 1, 1], [], []>} : vector<2x32xf32>, vector<32x128xf32>, vector<2x128xf32> -> vector<2x128xf32>
    %137 = arith.addf %134, %136 : vector<2x128xf32>
    %138 = vector.extract_strided_slice %137 {offsets = [0, 0], sizes = [2, 32], strides = [1, 1]} : vector<2x128xf32> to vector<2x32xf32>
    %139 = arith.negf %138 : vector<2x32xf32>
    %140 = math.exp %139 : vector<2x32xf32>
    %cst_74 = arith.constant 1.000000e+00 : f32
    %141 = vector.broadcast %cst_74 : f32 to vector<2x32xf32>
    %142 = arith.addf %141, %140 : vector<2x32xf32>
    %143 = arith.divf %141, %142 : vector<2x32xf32>
    %144 = vector.extract_strided_slice %137 {offsets = [0, 32], sizes = [2, 32], strides = [1, 1]} : vector<2x128xf32> to vector<2x32xf32>
    %145 = arith.negf %144 : vector<2x32xf32>
    %146 = math.exp %145 : vector<2x32xf32>
    %cst_75 = arith.constant 1.000000e+00 : f32
    %147 = vector.broadcast %cst_75 : f32 to vector<2x32xf32>
    %148 = arith.addf %147, %146 : vector<2x32xf32>
    %149 = arith.divf %147, %148 : vector<2x32xf32>
    %150 = vector.extract_strided_slice %137 {offsets = [0, 64], sizes = [2, 32], strides = [1, 1]} : vector<2x128xf32> to vector<2x32xf32>
    %151 = math.tanh %150 : vector<2x32xf32>
    %152 = vector.extract_strided_slice %137 {offsets = [0, 96], sizes = [2, 32], strides = [1, 1]} : vector<2x128xf32> to vector<2x32xf32>
    %153 = arith.negf %152 : vector<2x32xf32>
    %154 = math.exp %153 : vector<2x32xf32>
    %cst_76 = arith.constant 1.000000e+00 : f32
    %155 = vector.broadcast %cst_76 : f32 to vector<2x32xf32>
    %156 = arith.addf %155, %154 : vector<2x32xf32>
    %157 = arith.divf %155, %156 : vector<2x32xf32>
    %c0_77 = arith.constant 0 : index
    %c0_78 = arith.constant 0 : index
    %158 = vector.load %arg5[%c0_77, %c0_78] : memref<2x32xf32, #tpu.memory_space<vmem>>, vector<2x32xf32>
    %159 = arith.mulf %149, %158 : vector<2x32xf32>
    %160 = arith.mulf %143, %151 : vector<2x32xf32>
    %161 = arith.addf %159, %160 : vector<2x32xf32>
    %162 = math.tanh %161 : vector<2x32xf32>
    %163 = arith.mulf %157, %162 : vector<2x32xf32>
    %c0_79 = arith.constant 0 : index
    %c0_80 = arith.constant 0 : index
    %164 = vector.load %arg5[%c0_79, %c0_80] : memref<2x32xf32, #tpu.memory_space<vmem>>, vector<2x32xf32>
    tpu.vector_store %arg5[%c0_79, %c0_80], %161 {strides = array<i32>} : memref<2x32xf32, #tpu.memory_space<vmem>>, vector<2x32xf32>,
    %c0_81 = arith.constant 0 : index
    %c0_82 = arith.constant 0 : index
    %165 = vector.load %arg4[%c0_81, %c0_82] : memref<2x32xf32, #tpu.memory_space<vmem>>, vector<2x32xf32>
    tpu.vector_store %arg4[%c0_81, %c0_82], %163 {strides = array<i32>} : memref<2x32xf32, #tpu.memory_space<vmem>>, vector<2x32xf32>,
    %c0_83 = arith.constant 0 : index
    %166 = arith.index_cast %131 : i32 to index
    %c0_84 = arith.constant 0 : index
    %c0_85 = arith.constant 0 : index
    %167 = vector.load %arg3[%c0_83, %166, %c0_84, %c0_85] : memref<1x8x2x32xf32, #tpu.memory_space<vmem>>, vector<1x1x2x32xf32>
    %168 = vector.shape_cast %167 : vector<1x1x2x32xf32> to vector<2x32xf32>
    %169 = vector.shape_cast %163 : vector<2x32xf32> to vector<1x1x2x32xf32>
    tpu.vector_store %arg3[%c0_83, %166, %c0_84, %c0_85], %169 {strides = array<i32>} : memref<1x8x2x32xf32, #tpu.memory_space<vmem>>, vector<1x1x2x32xf32>,
    %c4_i32 = arith.constant 4 : i32
    %c0_i32_86 = arith.constant 0 : i32
    %170 = arith.cmpi eq, %arg0, %c0_i32_86 : i32
    %c7_i32_87 = arith.constant 7 : i32
    %171 = arith.subi %c7_i32_87, %c4_i32 : i32
    %172 = arith.select %170, %c4_i32, %171 : i32
    %c0_88 = arith.constant 0 : index
    %173 = arith.index_cast %172 : i32 to index
    %c0_89 = arith.constant 0 : index
    %c0_90 = arith.constant 0 : index
    %174 = vector.load %arg1[%c0_88, %173, %c0_89, %c0_90] : memref<1x8x2x128xf32, #tpu.memory_space<vmem>>, vector<1x1x2x128xf32>
    %175 = vector.shape_cast %174 : vector<1x1x2x128xf32> to vector<2x128xf32>
    %c0_91 = arith.constant 0 : index
    %c0_92 = arith.constant 0 : index
    %176 = vector.load %arg4[%c0_91, %c0_92] : memref<2x32xf32, #tpu.memory_space<vmem>>, vector<2x32xf32>
    %cst_93 = arith.constant dense<0.000000e+00> : vector<2x128xf32>
    %177 = tpu.matmul %176, %5, %cst_93 {dimension_numbers = #tpu.dot_dimension_numbers<[1], [0], [0], [1], [0, 0, 1, 1], [], []>} : vector<2x32xf32>, vector<32x128xf32>, vector<2x128xf32> -> vector<2x128xf32>
    %178 = arith.addf %175, %177 : vector<2x128xf32>
    %179 = vector.extract_strided_slice %178 {offsets = [0, 0], sizes = [2, 32], strides = [1, 1]} : vector<2x128xf32> to vector<2x32xf32>
    %180 = arith.negf %179 : vector<2x32xf32>
    %181 = math.exp %180 : vector<2x32xf32>
    %cst_94 = arith.constant 1.000000e+00 : f32
    %182 = vector.broadcast %cst_94 : f32 to vector<2x32xf32>
    %183 = arith.addf %182, %181 : vector<2x32xf32>
    %184 = arith.divf %182, %183 : vector<2x32xf32>
    %185 = vector.extract_strided_slice %178 {offsets = [0, 32], sizes = [2, 32], strides = [1, 1]} : vector<2x128xf32> to vector<2x32xf32>
    %186 = arith.negf %185 : vector<2x32xf32>
    %187 = math.exp %186 : vector<2x32xf32>
    %cst_95 = arith.constant 1.000000e+00 : f32
    %188 = vector.broadcast %cst_95 : f32 to vector<2x32xf32>
    %189 = arith.addf %188, %187 : vector<2x32xf32>
    %190 = arith.divf %188, %189 : vector<2x32xf32>
    %191 = vector.extract_strided_slice %178 {offsets = [0, 64], sizes = [2, 32], strides = [1, 1]} : vector<2x128xf32> to vector<2x32xf32>
    %192 = math.tanh %191 : vector<2x32xf32>
    %193 = vector.extract_strided_slice %178 {offsets = [0, 96], sizes = [2, 32], strides = [1, 1]} : vector<2x128xf32> to vector<2x32xf32>
    %194 = arith.negf %193 : vector<2x32xf32>
    %195 = math.exp %194 : vector<2x32xf32>
    %cst_96 = arith.constant 1.000000e+00 : f32
    %196 = vector.broadcast %cst_96 : f32 to vector<2x32xf32>
    %197 = arith.addf %196, %195 : vector<2x32xf32>
    %198 = arith.divf %196, %197 : vector<2x32xf32>
    %c0_97 = arith.constant 0 : index
    %c0_98 = arith.constant 0 : index
    %199 = vector.load %arg5[%c0_97, %c0_98] : memref<2x32xf32, #tpu.memory_space<vmem>>, vector<2x32xf32>
    %200 = arith.mulf %190, %199 : vector<2x32xf32>
    %201 = arith.mulf %184, %192 : vector<2x32xf32>
    %202 = arith.addf %200, %201 : vector<2x32xf32>
    %203 = math.tanh %202 : vector<2x32xf32>
    %204 = arith.mulf %198, %203 : vector<2x32xf32>
    %c0_99 = arith.constant 0 : index
    %c0_100 = arith.constant 0 : index
    %205 = vector.load %arg5[%c0_99, %c0_100] : memref<2x32xf32, #tpu.memory_space<vmem>>, vector<2x32xf32>
    tpu.vector_store %arg5[%c0_99, %c0_100], %202 {strides = array<i32>} : memref<2x32xf32, #tpu.memory_space<vmem>>, vector<2x32xf32>,
    %c0_101 = arith.constant 0 : index
    %c0_102 = arith.constant 0 : index
    %206 = vector.load %arg4[%c0_101, %c0_102] : memref<2x32xf32, #tpu.memory_space<vmem>>, vector<2x32xf32>
    tpu.vector_store %arg4[%c0_101, %c0_102], %204 {strides = array<i32>} : memref<2x32xf32, #tpu.memory_space<vmem>>, vector<2x32xf32>,
    %c0_103 = arith.constant 0 : index
    %207 = arith.index_cast %172 : i32 to index
    %c0_104 = arith.constant 0 : index
    %c0_105 = arith.constant 0 : index
    %208 = vector.load %arg3[%c0_103, %207, %c0_104, %c0_105] : memref<1x8x2x32xf32, #tpu.memory_space<vmem>>, vector<1x1x2x32xf32>
    %209 = vector.shape_cast %208 : vector<1x1x2x32xf32> to vector<2x32xf32>
    %210 = vector.shape_cast %204 : vector<2x32xf32> to vector<1x1x2x32xf32>
    tpu.vector_store %arg3[%c0_103, %207, %c0_104, %c0_105], %210 {strides = array<i32>} : memref<1x8x2x32xf32, #tpu.memory_space<vmem>>, vector<1x1x2x32xf32>,
    %c5_i32 = arith.constant 5 : i32
    %c0_i32_106 = arith.constant 0 : i32
    %211 = arith.cmpi eq, %arg0, %c0_i32_106 : i32
    %c7_i32_107 = arith.constant 7 : i32
    %212 = arith.subi %c7_i32_107, %c5_i32 : i32
    %213 = arith.select %211, %c5_i32, %212 : i32
    %c0_108 = arith.constant 0 : index
    %214 = arith.index_cast %213 : i32 to index
    %c0_109 = arith.constant 0 : index
    %c0_110 = arith.constant 0 : index
    %215 = vector.load %arg1[%c0_108, %214, %c0_109, %c0_110] : memref<1x8x2x128xf32, #tpu.memory_space<vmem>>, vector<1x1x2x128xf32>
    %216 = vector.shape_cast %215 : vector<1x1x2x128xf32> to vector<2x128xf32>
    %c0_111 = arith.constant 0 : index
    %c0_112 = arith.constant 0 : index
    %217 = vector.load %arg4[%c0_111, %c0_112] : memref<2x32xf32, #tpu.memory_space<vmem>>, vector<2x32xf32>
    %cst_113 = arith.constant dense<0.000000e+00> : vector<2x128xf32>
    %218 = tpu.matmul %217, %5, %cst_113 {dimension_numbers = #tpu.dot_dimension_numbers<[1], [0], [0], [1], [0, 0, 1, 1], [], []>} : vector<2x32xf32>, vector<32x128xf32>, vector<2x128xf32> -> vector<2x128xf32>
    %219 = arith.addf %216, %218 : vector<2x128xf32>
    %220 = vector.extract_strided_slice %219 {offsets = [0, 0], sizes = [2, 32], strides = [1, 1]} : vector<2x128xf32> to vector<2x32xf32>
    %221 = arith.negf %220 : vector<2x32xf32>
    %222 = math.exp %221 : vector<2x32xf32>
    %cst_114 = arith.constant 1.000000e+00 : f32
    %223 = vector.broadcast %cst_114 : f32 to vector<2x32xf32>
    %224 = arith.addf %223, %222 : vector<2x32xf32>
    %225 = arith.divf %223, %224 : vector<2x32xf32>
    %226 = vector.extract_strided_slice %219 {offsets = [0, 32], sizes = [2, 32], strides = [1, 1]} : vector<2x128xf32> to vector<2x32xf32>
    %227 = arith.negf %226 : vector<2x32xf32>
    %228 = math.exp %227 : vector<2x32xf32>
    %cst_115 = arith.constant 1.000000e+00 : f32
    %229 = vector.broadcast %cst_115 : f32 to vector<2x32xf32>
    %230 = arith.addf %229, %228 : vector<2x32xf32>
    %231 = arith.divf %229, %230 : vector<2x32xf32>
    %232 = vector.extract_strided_slice %219 {offsets = [0, 64], sizes = [2, 32], strides = [1, 1]} : vector<2x128xf32> to vector<2x32xf32>
    %233 = math.tanh %232 : vector<2x32xf32>
    %234 = vector.extract_strided_slice %219 {offsets = [0, 96], sizes = [2, 32], strides = [1, 1]} : vector<2x128xf32> to vector<2x32xf32>
    %235 = arith.negf %234 : vector<2x32xf32>
    %236 = math.exp %235 : vector<2x32xf32>
    %cst_116 = arith.constant 1.000000e+00 : f32
    %237 = vector.broadcast %cst_116 : f32 to vector<2x32xf32>
    %238 = arith.addf %237, %236 : vector<2x32xf32>
    %239 = arith.divf %237, %238 : vector<2x32xf32>
    %c0_117 = arith.constant 0 : index
    %c0_118 = arith.constant 0 : index
    %240 = vector.load %arg5[%c0_117, %c0_118] : memref<2x32xf32, #tpu.memory_space<vmem>>, vector<2x32xf32>
    %241 = arith.mulf %231, %240 : vector<2x32xf32>
    %242 = arith.mulf %225, %233 : vector<2x32xf32>
    %243 = arith.addf %241, %242 : vector<2x32xf32>
    %244 = math.tanh %243 : vector<2x32xf32>
    %245 = arith.mulf %239, %244 : vector<2x32xf32>
    %c0_119 = arith.constant 0 : index
    %c0_120 = arith.constant 0 : index
    %246 = vector.load %arg5[%c0_119, %c0_120] : memref<2x32xf32, #tpu.memory_space<vmem>>, vector<2x32xf32>
    tpu.vector_store %arg5[%c0_119, %c0_120], %243 {strides = array<i32>} : memref<2x32xf32, #tpu.memory_space<vmem>>, vector<2x32xf32>,
    %c0_121 = arith.constant 0 : index
    %c0_122 = arith.constant 0 : index
    %247 = vector.load %arg4[%c0_121, %c0_122] : memref<2x32xf32, #tpu.memory_space<vmem>>, vector<2x32xf32>
    tpu.vector_store %arg4[%c0_121, %c0_122], %245 {strides = array<i32>} : memref<2x32xf32, #tpu.memory_space<vmem>>, vector<2x32xf32>,
    %c0_123 = arith.constant 0 : index
    %248 = arith.index_cast %213 : i32 to index
    %c0_124 = arith.constant 0 : index
    %c0_125 = arith.constant 0 : index
    %249 = vector.load %arg3[%c0_123, %248, %c0_124, %c0_125] : memref<1x8x2x32xf32, #tpu.memory_space<vmem>>, vector<1x1x2x32xf32>
    %250 = vector.shape_cast %249 : vector<1x1x2x32xf32> to vector<2x32xf32>
    %251 = vector.shape_cast %245 : vector<2x32xf32> to vector<1x1x2x32xf32>
    tpu.vector_store %arg3[%c0_123, %248, %c0_124, %c0_125], %251 {strides = array<i32>} : memref<1x8x2x32xf32, #tpu.memory_space<vmem>>, vector<1x1x2x32xf32>,
    %c6_i32 = arith.constant 6 : i32
    %c0_i32_126 = arith.constant 0 : i32
    %252 = arith.cmpi eq, %arg0, %c0_i32_126 : i32
    %c7_i32_127 = arith.constant 7 : i32
    %253 = arith.subi %c7_i32_127, %c6_i32 : i32
    %254 = arith.select %252, %c6_i32, %253 : i32
    %c0_128 = arith.constant 0 : index
    %255 = arith.index_cast %254 : i32 to index
    %c0_129 = arith.constant 0 : index
    %c0_130 = arith.constant 0 : index
    %256 = vector.load %arg1[%c0_128, %255, %c0_129, %c0_130] : memref<1x8x2x128xf32, #tpu.memory_space<vmem>>, vector<1x1x2x128xf32>
    %257 = vector.shape_cast %256 : vector<1x1x2x128xf32> to vector<2x128xf32>
    %c0_131 = arith.constant 0 : index
    %c0_132 = arith.constant 0 : index
    %258 = vector.load %arg4[%c0_131, %c0_132] : memref<2x32xf32, #tpu.memory_space<vmem>>, vector<2x32xf32>
    %cst_133 = arith.constant dense<0.000000e+00> : vector<2x128xf32>
    %259 = tpu.matmul %258, %5, %cst_133 {dimension_numbers = #tpu.dot_dimension_numbers<[1], [0], [0], [1], [0, 0, 1, 1], [], []>} : vector<2x32xf32>, vector<32x128xf32>, vector<2x128xf32> -> vector<2x128xf32>
    %260 = arith.addf %257, %259 : vector<2x128xf32>
    %261 = vector.extract_strided_slice %260 {offsets = [0, 0], sizes = [2, 32], strides = [1, 1]} : vector<2x128xf32> to vector<2x32xf32>
    %262 = arith.negf %261 : vector<2x32xf32>
    %263 = math.exp %262 : vector<2x32xf32>
    %cst_134 = arith.constant 1.000000e+00 : f32
    %264 = vector.broadcast %cst_134 : f32 to vector<2x32xf32>
    %265 = arith.addf %264, %263 : vector<2x32xf32>
    %266 = arith.divf %264, %265 : vector<2x32xf32>
    %267 = vector.extract_strided_slice %260 {offsets = [0, 32], sizes = [2, 32], strides = [1, 1]} : vector<2x128xf32> to vector<2x32xf32>
    %268 = arith.negf %267 : vector<2x32xf32>
    %269 = math.exp %268 : vector<2x32xf32>
    %cst_135 = arith.constant 1.000000e+00 : f32
    %270 = vector.broadcast %cst_135 : f32 to vector<2x32xf32>
    %271 = arith.addf %270, %269 : vector<2x32xf32>
    %272 = arith.divf %270, %271 : vector<2x32xf32>
    %273 = vector.extract_strided_slice %260 {offsets = [0, 64], sizes = [2, 32], strides = [1, 1]} : vector<2x128xf32> to vector<2x32xf32>
    %274 = math.tanh %273 : vector<2x32xf32>
    %275 = vector.extract_strided_slice %260 {offsets = [0, 96], sizes = [2, 32], strides = [1, 1]} : vector<2x128xf32> to vector<2x32xf32>
    %276 = arith.negf %275 : vector<2x32xf32>
    %277 = math.exp %276 : vector<2x32xf32>
    %cst_136 = arith.constant 1.000000e+00 : f32
    %278 = vector.broadcast %cst_136 : f32 to vector<2x32xf32>
    %279 = arith.addf %278, %277 : vector<2x32xf32>
    %280 = arith.divf %278, %279 : vector<2x32xf32>
    %c0_137 = arith.constant 0 : index
    %c0_138 = arith.constant 0 : index
    %281 = vector.load %arg5[%c0_137, %c0_138] : memref<2x32xf32, #tpu.memory_space<vmem>>, vector<2x32xf32>
    %282 = arith.mulf %272, %281 : vector<2x32xf32>
    %283 = arith.mulf %266, %274 : vector<2x32xf32>
    %284 = arith.addf %282, %283 : vector<2x32xf32>
    %285 = math.tanh %284 : vector<2x32xf32>
    %286 = arith.mulf %280, %285 : vector<2x32xf32>
    %c0_139 = arith.constant 0 : index
    %c0_140 = arith.constant 0 : index
    %287 = vector.load %arg5[%c0_139, %c0_140] : memref<2x32xf32, #tpu.memory_space<vmem>>, vector<2x32xf32>
    tpu.vector_store %arg5[%c0_139, %c0_140], %284 {strides = array<i32>} : memref<2x32xf32, #tpu.memory_space<vmem>>, vector<2x32xf32>,
    %c0_141 = arith.constant 0 : index
    %c0_142 = arith.constant 0 : index
    %288 = vector.load %arg4[%c0_141, %c0_142] : memref<2x32xf32, #tpu.memory_space<vmem>>, vector<2x32xf32>
    tpu.vector_store %arg4[%c0_141, %c0_142], %286 {strides = array<i32>} : memref<2x32xf32, #tpu.memory_space<vmem>>, vector<2x32xf32>,
    %c0_143 = arith.constant 0 : index
    %289 = arith.index_cast %254 : i32 to index
    %c0_144 = arith.constant 0 : index
    %c0_145 = arith.constant 0 : index
    %290 = vector.load %arg3[%c0_143, %289, %c0_144, %c0_145] : memref<1x8x2x32xf32, #tpu.memory_space<vmem>>, vector<1x1x2x32xf32>
    %291 = vector.shape_cast %290 : vector<1x1x2x32xf32> to vector<2x32xf32>
    %292 = vector.shape_cast %286 : vector<2x32xf32> to vector<1x1x2x32xf32>
    tpu.vector_store %arg3[%c0_143, %289, %c0_144, %c0_145], %292 {strides = array<i32>} : memref<1x8x2x32xf32, #tpu.memory_space<vmem>>, vector<1x1x2x32xf32>,
    %c7_i32_146 = arith.constant 7 : i32
    %c0_i32_147 = arith.constant 0 : i32
    %293 = arith.cmpi eq, %arg0, %c0_i32_147 : i32
    %c7_i32_148 = arith.constant 7 : i32
    %294 = arith.subi %c7_i32_148, %c7_i32_146 : i32
    %295 = arith.select %293, %c7_i32_146, %294 : i32
    %c0_149 = arith.constant 0 : index
    %296 = arith.index_cast %295 : i32 to index
    %c0_150 = arith.constant 0 : index
    %c0_151 = arith.constant 0 : index
    %297 = vector.load %arg1[%c0_149, %296, %c0_150, %c0_151] : memref<1x8x2x128xf32, #tpu.memory_space<vmem>>, vector<1x1x2x128xf32>
    %298 = vector.shape_cast %297 : vector<1x1x2x128xf32> to vector<2x128xf32>
    %c0_152 = arith.constant 0 : index
    %c0_153 = arith.constant 0 : index
    %299 = vector.load %arg4[%c0_152, %c0_153] : memref<2x32xf32, #tpu.memory_space<vmem>>, vector<2x32xf32>
    %cst_154 = arith.constant dense<0.000000e+00> : vector<2x128xf32>
    %300 = tpu.matmul %299, %5, %cst_154 {dimension_numbers = #tpu.dot_dimension_numbers<[1], [0], [0], [1], [0, 0, 1, 1], [], []>} : vector<2x32xf32>, vector<32x128xf32>, vector<2x128xf32> -> vector<2x128xf32>
    %301 = arith.addf %298, %300 : vector<2x128xf32>
    %302 = vector.extract_strided_slice %301 {offsets = [0, 0], sizes = [2, 32], strides = [1, 1]} : vector<2x128xf32> to vector<2x32xf32>
    %303 = arith.negf %302 : vector<2x32xf32>
    %304 = math.exp %303 : vector<2x32xf32>
    %cst_155 = arith.constant 1.000000e+00 : f32
    %305 = vector.broadcast %cst_155 : f32 to vector<2x32xf32>
    %306 = arith.addf %305, %304 : vector<2x32xf32>
    %307 = arith.divf %305, %306 : vector<2x32xf32>
    %308 = vector.extract_strided_slice %301 {offsets = [0, 32], sizes = [2, 32], strides = [1, 1]} : vector<2x128xf32> to vector<2x32xf32>
    %309 = arith.negf %308 : vector<2x32xf32>
    %310 = math.exp %309 : vector<2x32xf32>
    %cst_156 = arith.constant 1.000000e+00 : f32
    %311 = vector.broadcast %cst_156 : f32 to vector<2x32xf32>
    %312 = arith.addf %311, %310 : vector<2x32xf32>
    %313 = arith.divf %311, %312 : vector<2x32xf32>
    %314 = vector.extract_strided_slice %301 {offsets = [0, 64], sizes = [2, 32], strides = [1, 1]} : vector<2x128xf32> to vector<2x32xf32>
    %315 = math.tanh %314 : vector<2x32xf32>
    %316 = vector.extract_strided_slice %301 {offsets = [0, 96], sizes = [2, 32], strides = [1, 1]} : vector<2x128xf32> to vector<2x32xf32>
    %317 = arith.negf %316 : vector<2x32xf32>
    %318 = math.exp %317 : vector<2x32xf32>
    %cst_157 = arith.constant 1.000000e+00 : f32
    %319 = vector.broadcast %cst_157 : f32 to vector<2x32xf32>
    %320 = arith.addf %319, %318 : vector<2x32xf32>
    %321 = arith.divf %319, %320 : vector<2x32xf32>
    %c0_158 = arith.constant 0 : index
    %c0_159 = arith.constant 0 : index
    %322 = vector.load %arg5[%c0_158, %c0_159] : memref<2x32xf32, #tpu.memory_space<vmem>>, vector<2x32xf32>
    %323 = arith.mulf %313, %322 : vector<2x32xf32>
    %324 = arith.mulf %307, %315 : vector<2x32xf32>
    %325 = arith.addf %323, %324 : vector<2x32xf32>
    %326 = math.tanh %325 : vector<2x32xf32>
    %327 = arith.mulf %321, %326 : vector<2x32xf32>
    %c0_160 = arith.constant 0 : index
    %c0_161 = arith.constant 0 : index
    %328 = vector.load %arg5[%c0_160, %c0_161] : memref<2x32xf32, #tpu.memory_space<vmem>>, vector<2x32xf32>
    tpu.vector_store %arg5[%c0_160, %c0_161], %325 {strides = array<i32>} : memref<2x32xf32, #tpu.memory_space<vmem>>, vector<2x32xf32>,
    %c0_162 = arith.constant 0 : index
    %c0_163 = arith.constant 0 : index
    %329 = vector.load %arg4[%c0_162, %c0_163] : memref<2x32xf32, #tpu.memory_space<vmem>>, vector<2x32xf32>
    tpu.vector_store %arg4[%c0_162, %c0_163], %327 {strides = array<i32>} : memref<2x32xf32, #tpu.memory_space<vmem>>, vector<2x32xf32>,
    %c0_164 = arith.constant 0 : index
    %330 = arith.index_cast %295 : i32 to index
    %c0_165 = arith.constant 0 : index
    %c0_166 = arith.constant 0 : index
    %331 = vector.load %arg3[%c0_164, %330, %c0_165, %c0_166] : memref<1x8x2x32xf32, #tpu.memory_space<vmem>>, vector<1x1x2x32xf32>
    %332 = vector.shape_cast %331 : vector<1x1x2x32xf32> to vector<2x32xf32>
    %333 = vector.shape_cast %327 : vector<2x32xf32> to vector<1x1x2x32xf32>
    tpu.vector_store %arg3[%c0_164, %330, %c0_165, %c0_166], %333 {strides = array<i32>} : memref<1x8x2x32xf32, #tpu.memory_space<vmem>>, vector<1x1x2x32xf32>,
    %c8_i32 = arith.constant 8 : i32
    return
  }
  func.func @transform_0(%arg0: i32) -> (i32, i32, i32, i32) {
    %c0_i32 = arith.constant 0 : i32
    %c0_i32_0 = arith.constant 0 : i32
    %c0_i32_1 = arith.constant 0 : i32
    %c0_i32_2 = arith.constant 0 : i32
    return %arg0, %c0_i32, %c0_i32_0, %c0_i32_1 : i32, i32, i32, i32
  }
  func.func @transform_1(%arg0: i32) -> (i32, i32, i32) {
    %c0_i32 = arith.constant 0 : i32
    %c0_i32_0 = arith.constant 0 : i32
    %c0_i32_1 = arith.constant 0 : i32
    return %arg0, %c0_i32, %c0_i32_0 : i32, i32, i32
  }
  func.func @transform_2(%arg0: i32) -> (i32, i32, i32, i32) {
    %c0_i32 = arith.constant 0 : i32
    %c0_i32_0 = arith.constant 0 : i32
    %c0_i32_1 = arith.constant 0 : i32
    %c0_i32_2 = arith.constant 0 : i32
    return %arg0, %c0_i32, %c0_i32_0, %c0_i32_1 : i32, i32, i32, i32
  }
}

</mosaic_0001>

<bundles_post_ra>
// kernel: elmo_forward_pretrain.5
= control target key start
LH: loop header
LB: loop body
LE: loop exit
PB: predicated region body
PF: predicated region fallthrough
CT: control target
= control target key end

     0   :  { %vm29_vm0 = vcmask 261120   ;;  %vm127_vm1 = vcmask 523264   ;;  %s238_s1 = inlined_call_operand.vmem [shape: f32[32,64], index: 1, kind: input, shape index: {}]   ;;  %s239_s0 = inlined_call_operand.vmem [shape: f32[32,32], index: 0, kind: input, shape index: {}]   ;;  %s240_s2 = inlined_call_operand.vmem [shape: f32[1,64], index: 2, kind: input, shape index: {}]   ;;  %s241_s3 = inlined_call_operand.vmem [shape: f32[32,64], index: 3, kind: output, shape index: {}]  }
   0x1   :  { %v18_v0 = vld [vmem:[%s238_s1] sm:$0xff]  ;;  %v19_v1 = vld [vmem:[%s238_s1 + $0x8] sm:$0xff]  ;;  %v20_v2 = vld [vmem:[%s238_s1 + $0x10] sm:$0xff] }
   0x2   :  { %v163_v3 = vpack.c.bf16 %v19_v1, %v18_v0  ;;  %v21_v4 = vld [vmem:[%s238_s1 + $0x18] sm:$0xff]  ;;  %v14_v5 = vld [vmem:[%s239_s0] sm:$0xff]  ;;  %v16_v6 = vld [vmem:[%s239_s0 + $0x10] sm:$0xff] }
   0x3   :  { %v167_v7 = vpack.c.bf16 %v21_v4, %v20_v2  ;;  %157 = vmatprep.mubr.msk.f32.mxu0 %vm29_vm0, %v14_v5  ;;  %160 = vmatprep.mubr.msk.f32.mxu1 %vm29_vm0, %v16_v6  ;;  %v15_v8 = vld [vmem:[%s239_s0 + $0x8] sm:$0xff]  ;;  %v17_v9 = vld [vmem:[%s239_s0 + $0x18] sm:$0xff]  ;;  %v136_v10 = vld [vmem:[%s240_s2] ss:$0 sm:$0xff] }
   0x4   :  { %164 = vmatprep.subr.bf16.mxu0 %v163_v3  ;;  %171 = vmatprep.subr.bf16.mxu1 %v163_v3 }
   0x5   :  { %166 = vmatpush3.bf16.msra.mxu0 %v163_v3  ;;  %173 = vmatpush3.bf16.msra.mxu1 %v163_v3 }
   0x6   :  { %168 = vmatprep.subr.bf16.mxu0 %v167_v7  ;;  %172 = vmatprep.subr.bf16.mxu1 %v167_v7 }
   0x9   :  { %170 = vmatpush3.bf16.msra.mxu0 %v167_v7  ;;  %174 = vmatpush3.bf16.msra.mxu1 %v167_v7 }
   0xc   :  { %158 = vmatmul.mubr.msk.f32.vlgmr.msra.gmra.mrb[0].mxu0 %vm29_vm0, %v15_v8  ;;  %161 = vmatmul.mubr.msk.f32.vlgmr.msra.gmra.mrb[0].mxu1 %vm29_vm0, %v17_v9 }
  0xdf   :  { %v159_v11 = vpop.f32.mrb[0].mxu0  ;;  %v162_v12 = vpop.f32.mrb[0].mxu1 }
  0xe0   :  { %v114_v13 = vadd.f32 %v159_v11, %v136_v10  ;;  %v124_v14 = vadd.f32 %v162_v12, %v136_v10  ;;  %v108_v15 = vpop.f32.mrb[1].mxu0  ;;  %v118_v16 = vpop.f32.mrb[1].mxu1 }
  0xe1   :  { %v109_v17 = vadd.f32 %v136_v10, %v108_v15  ;;  %v119_v18 = vadd.f32 %v136_v10, %v118_v16 }
  0xe2   :  { %129 = vst.msk [vmem:[%s241_s3 + $0x8] sm:$0xff] %vm127_vm1, %v114_v13  ;;  %131 = vst.msk [vmem:[%s241_s3 + $0x18] sm:$0xff] %vm127_vm1, %v124_v14 }
  0xe3   :  { %128 = vst.msk [vmem:[%s241_s3] sm:$0xff] %vm127_vm1, %v109_v17  ;;  %130 = vst.msk [vmem:[%s241_s3 + $0x10] sm:$0xff] %vm127_vm1, %v119_v18 }

// kernel: elmo_forward_pretrain.3
= control target key start
LH: loop header
LB: loop body
LE: loop exit
PB: predicated region body
PF: predicated region fallthrough
CT: control target
= control target key end

     0   :  { %s542_s12 = smov 0   ;;  %s544_s13 = smov 0   ;;  %s586_s0 = inlined_call_operand.vmem [shape: f32[16,32], index: 0, kind: input, shape index: {}]   ;;  %s587_s1 = inlined_call_operand.vmem [shape: f32[2,32,128], index: 1, kind: input, shape index: {}]   ;;  %s588_s2 = inlined_call_operand.vmem [shape: f32[2,1,128], index: 2, kind: input, shape index: {}]   ;;  %s589_s3 = inlined_call_operand.vmem [shape: f32[2,16,128], index: 3, kind: output, shape index: {}]  }
   0x1   :  { %s546_s14 = smov 0  }
   0x2 LB: > { %s25_s15 = sadd.s32 1, %s516_s13  ;;  %p437_p0 = scmp.ge.s32.totalorder %s520_s14, 1  ;;  %s520_s14 = sphi %s546_s14, %s13_s14   ;;  %s516_s13 = sphi %s544_s13, %s591_s13   ;;  %s512_s12 = sphi %s542_s12, %s590_s12  }
   0x3   : > { %p27_p1 = scmp.ge.s32.totalorder %s25_s15, 2  ;;  %p170_p2 = scmp.lt.s32.totalorder %s520_s14, 3 }
   0x5   : > { %s593_s15 = smov (%p27_p1, %s25_s15), 0  ;;  %p171_p3 = pnand %p437_p0, %p170_p2 }
   0x6   : > { %p212_p4 = scmp.lt.s32.totalorder (!%p171_p3), %s512_s12, 1  ;;  %v230_v0 = vld [vmem:[%s586_s0] sm:$0xff] (!%p171_p3)  ;;  %vm243_vm0 = vcmask (!%p171_p3), 261120   ;;  %v231_v7 = vld [vmem:[%s586_s0 + $0x8] sm:$0xff] (!%p171_p3) }
   0x7   : > { %174 = sbr.rel (%p171_p3) target bundleno = 244 (0xf4), region = 32  ;;  %463 = vmatprep.mubr.msk.f32.mxu0 (!%p171_p3), %vm243_vm0, %v230_v0 }
   0xe   : > { %s595_s12 = smov (!%p212_p4, %s512_s12), 1 }
   0xf   : > { %s447_s18 = sshll.u32 %s595_s12, 5  ;;  %s219_s26 = scalar_lea.vmem %s588_s2, %s595_s12 }
  0x10   : > { %s216_s21 = scalar_lea.vmem %s587_s1, %s447_s18  ;;  %s448_s27 = sshll.u32 %s595_s12, 4  ;;  %v442_v8 = vld [vmem:[%s219_s26] ss:$0 sm:$0xff] }
  0x11   : > { %v232_v1 = vld [vmem:[%s216_s21] sm:$0xff]  ;;  %v233_v2 = vld [vmem:[%s216_s21 + $0x8] sm:$0xff]  ;;  %v234_v3 = vld [vmem:[%s216_s21 + $0x10] sm:$0xff]  ;;  %s228_s30 = scalar_lea.vmem %s589_s3, %s448_s27 }
  0x12   : > { %v466_v4 = vpack.c.bf16 %v233_v2, %v232_v1  ;;  %v235_v5 = vld [vmem:[%s216_s21 + $0x18] sm:$0xff] }
  0x13   : > { %v470_v6 = vpack.c.bf16 %v235_v5, %v234_v3 }
  0x14   : > { %467 = vmatprep.subr.bf16.mxu0 %v466_v4 }
  0x15   : > { %469 = vmatpush3.bf16.msra.mxu0 %v466_v4 }
  0x16   : > { %471 = vmatprep.subr.bf16.mxu0 %v470_v6 }
  0x19   : > { %473 = vmatpush3.bf16.msra.mxu0 %v470_v6 }
  0x1c   : > { %464 = vmatmul.mubr.msk.f32.vlgmr.msra.gmra.mrb[0].mxu0 %vm243_vm0, %v231_v7 }
  0xef   : > { %v465_v9 = vpop.f32.mrb[0].mxu0 }
  0xf0   : > { %v322_v10 = vadd.f32 %v465_v9, %v442_v8  ;;  %v316_v11 = vpop.f32.mrb[1].mxu0 }
  0xf1   : > { %v317_v12 = vadd.f32 %v442_v8, %v316_v11 }
  0xf2   : > { %326 = vst [vmem:[%s228_s30 + $0x8] sm:$0xff] %v322_v10 }
  0xf3   : > { %325 = vst [vmem:[%s228_s30] sm:$0xff] %v317_v12 }
  0xf4 PF: > { %s13_s14 = sadd.s32 1, %s520_s14   ;;  %s590_s12 = smov %s516_s13 }
  0xf5   : > { %p10_p5 = scmp.ge.s32.totalorder %s13_s14, 4   ;;  %s591_s13 = smov %s593_s15 }
  0xf7   :  { %12 = sbr.rel (!%p10_p5) target bundleno = 2 (0x2), region = 68 }

// kernel: elmo_forward_pretrain.4
= control target key start
LH: loop header
LB: loop body
LE: loop exit
PB: predicated region body
PF: predicated region fallthrough
CT: control target
= control target key end

     0   :  { %s1555_s9 = smov 0   ;;  %s1816_s0 = inlined_call_operand.vmem [shape: f32[2,8,2,128], index: 0, kind: input, shape index: {}]   ;;  %s1817_s1 = inlined_call_operand.vmem [shape: f32[2,32,128], index: 1, kind: input, shape index: {}]   ;;  %s1818_s2 = inlined_call_operand.vmem [shape: f32[2,8,2,32], index: 2, kind: output, shape index: {}]  }
   0x1 LB: > { %s1561_s10 = sadd.s32 4294967295, %s1532_s9   ;;  %p1236_p0 = scmp.ge.s32.totalorder %s1532_s9, 1  ;;  %s1532_s9 = sphi %s1555_s9, %s12_s9  }
   0x2   : > { %p122_p1 = scmp.lt.s32.totalorder %s1532_s9, 3 }
   0x4   : > { %p123_p2 = pnand %p1236_p0, %p122_p1 }
   0x5   : > { %p149_p3 = scmp.lt.s32.totalorder (!%p123_p2), %s1561_s10, 1  ;;  %vm164_vm0 = vcmask (!%p123_p2), 254976   ;;  %v1534_v0 = vmov (!%p123_p2), 0.0|0.0   ;;  %v1535_v1 = vmov (!%p123_p2), 0.0   ;;  %vm1536_vm1 = vmmov (!%p123_p2), 0   ;;  %p171_p4 = scmp.eq.s32.totalorder (!%p123_p2), %s1561_s10, 0 }
   0x6   : > { %126 = sbr.rel (%p123_p2) target bundleno = 5700 (0x1644), region = 28  ;;  %1400 = vmatprep.subr.bf16.mxu0 (!%p123_p2), %v1534_v0  ;;  %165 = vst.msk [vmem:[#allocation2] sm:$0x3] (!%p123_p2), %vm164_vm0, %v1535_v1  ;;  %166 = vst.msk [vmem:[#allocation3] sm:$0x3] (!%p123_p2), %vm164_vm0, %v1535_v1  ;;  %1320 = vmatprep.mubr.msk.f32.mxu0 (!%p123_p2), %vm1536_vm1, %v1535_v1  ;;  %vm177_vm2 = vcmask (!%p123_p2), 261120  }
   0x7   : > { %1406 = vmatprep.subr.bf16.mxu1 (!%p123_p2), %v1534_v0  ;;  %1331 = vmatprep.mubr.msk.f32.mxu1 (!%p123_p2), %vm1536_vm1, %v1535_v1  ;;  %s1537_s23 = smov (!%p123_p2), 64   ;;  %s1538_s24 = smov (!%p123_p2), 32  }
   0x8   : > { %s1539_s25 = smov (!%p123_p2), 96  }
   0xd   : > { %s1574_s11 = scalar_select %p149_p3, %s1561_s10, 1  ;;  %v176_v8 = vld [vmem:[#allocation2] sm:$0x3]  ;;  %v259_v14 = vld [vmem:[#allocation3] sm:$0x3] }
   0xe   : > { %s1605_s16 = scalar_select %p171_p4, 0, 7 }
   0xf   : > { %s1270_s12 = sshll.u32 %s1574_s11, 5  ;;  %s1269_s17 = sshll.u32 %s1574_s11, 4 }
  0x10   : > { %s158_s15 = scalar_lea.vmem %s1817_s1, %s1270_s12  ;;  %s1613_s20 = scalar_lea.vmem %s1816_s0, %s1269_s17 }
  0x11   : > { %v167_v2 = vld [vmem:[%s158_s15] sm:$0xff]  ;;  %v168_v3 = vld [vmem:[%s158_s15 + $0x8] sm:$0xff]  ;;  %v169_v4 = vld [vmem:[%s158_s15 + $0x10] sm:$0xff]  ;;  %s1243_s21 = sshll.u32 %s1605_s16, 1  ;;  %s1632_s28 = scalar_lea.vmem %s1818_s2, %s1269_s17 }
  0x12   : > { %v1583_v5 = vpack.c.bf16 %v168_v3, %v167_v2  ;;  %v170_v6 = vld [vmem:[%s158_s15 + $0x18] sm:$0xff]  ;;  %s174_s22 = scalar_lea.vmem %s1613_s20, %s1243_s21  ;;  %s291_s29 = scalar_lea.vmem %s1632_s28, %s1243_s21 }
  0x13   : > { %v1586_v7 = vpack.c.bf16 %v170_v6, %v169_v4  ;;  %v175_v9 = vld [vmem:[%s174_s22] sm:$0x3]  ;;  %s1648_s30 = scalar_select %p171_p4, 1, 6 }
  0x14   : > { %1402 = vmatpush3.bf16.msra.mxu0 %v1583_v5  ;;  %1408 = vmatpush3.bf16.msra.mxu1 %v1583_v5  ;;  %s1675_s6 = scalar_select %p171_p4, 2, 5 }
  0x15   : > { %1403 = vmatprep.subr.bf16.mxu0 %v1534_v0  ;;  %1409 = vmatprep.subr.bf16.mxu1 %v1534_v0  ;;  %s1246_s3 = sshll.u32 %s1648_s30, 1 }
  0x16   : > { %s295_s4 = scalar_lea.vmem %s1613_s20, %s1246_s3  ;;  %s411_s5 = scalar_lea.vmem %s1632_s28, %s1246_s3 }
  0x17   : > { %v296_v32 = vld [vmem:[%s295_s4] sm:$0x3]  ;;  %s1249_s7 = sshll.u32 %s1675_s6, 1 }
  0x18   : > { %1405 = vmatpush3.bf16.msra.mxu0 %v1586_v7  ;;  %1411 = vmatpush3.bf16.msra.mxu1 %v1586_v7  ;;  %s415_s8 = scalar_lea.vmem %s1613_s20, %s1249_s7  ;;  %s531_s11 = scalar_lea.vmem %s1632_s28, %s1249_s7 }
  0x19   : > { %1412 = vmatprep.subr.bf16.mxu0 %v1534_v0  ;;  %1418 = vmatprep.subr.bf16.mxu1 %v1534_v0  ;;  %v416_v54 = vld [vmem:[%s415_s8] sm:$0x3]  ;;  %s1702_s12 = scalar_select %p171_p4, 3, 4 }
  0x1a   : > { %s1728_s16 = scalar_select %p171_p4, 4, 3 }
  0x1b   : > { %1321 = vmatmul.mubr.msk.f32.vlgmr.msra.gmra.mrb[0].mxu0 %vm177_vm2, %v176_v8  ;;  %s1252_s13 = sshll.u32 %s1702_s12, 1 }
  0x1c   : > { %1414 = vmatpush3.bf16.msra.mxu0 %v1583_v5  ;;  %1342 = vmatprep.mubr.msk.f32.mxu0 %vm1536_vm1, %v1535_v1  ;;  %s535_s14 = scalar_lea.vmem %s1613_s20, %s1252_s13  ;;  %s651_s15 = scalar_lea.vmem %s1632_s28, %s1252_s13 }
  0x1d   : > { %1415 = vmatprep.subr.bf16.mxu0 %v1534_v0  ;;  %s1255_s17 = sshll.u32 %s1728_s16, 1 }
  0x1e   : > { %s655_s18 = scalar_lea.vmem %s1613_s20, %s1255_s17  ;;  %s771_s19 = scalar_lea.vmem %s1632_s28, %s1255_s17 }
  0x1f   : > { %s1754_s21 = scalar_select %p171_p4, 5, 2 }
  0x20   : > { %1417 = vmatpush3.bf16.msra.mxu0 %v1586_v7 }
  0x21   : > { %1424 = vmatprep.subr.bf16.mxu0 %v1534_v0  ;;  %s1258_s22 = sshll.u32 %s1754_s21, 1 }
  0x22   : > { %s775_s26 = scalar_lea.vmem %s1613_s20, %s1258_s22  ;;  %s891_s27 = scalar_lea.vmem %s1632_s28, %s1258_s22 }
  0xee   : > { %v247_v10 = vpop.f32.mrb[0].mxu0 }
  0xef   : > { %v251_v11 = vadd.f32 %v247_v10, %v175_v9  ;;  %v1322_v12 = vpop.f32.mrb[1].mxu0 }
  0xf1   : > { %1462 = vtanh.f32 %v251_v11  ;;  %v1245_v15 = vmul.f32 -1.442695, %v251_v11 }
  0xf3   : > { %1464 = vpow2.f32 %v1245_v15 }
  0xfb   : > { %v1463_v13 = vpop.eup %1462 }
  0xfc   : > { %266 = vrot.lane.b32.xlu0 %v1463_v13, %s1537_s23 }
  0xfd   : > { %v1465_v16 = vpop.eup %1464 }
  0xfe   : > { %v255_v17 = vadd.f32 1.0, %v1465_v16  ;;  %v536_v16 = vld [vmem:[%s535_s14] sm:$0x3] }
 0x100   : > { %261 = vrot.lane.b32.xlu0 %v259_v14, %s1538_s24  ;;  %1466 = vrcp.f32 %v255_v17 }
 0x10a   : > { %v1467_v18 = vpop.eup %1466 }
 0x16e   : > { %v267_v19 = vpop.permute.xlu0 %266 }
 0x16f   : > { %v269_v20 = vmul.f32 %v1467_v18, %v267_v19 }
 0x171   : > { %271 = vrot.lane.b32.xlu1 %v269_v20, %s1538_s24 }
 0x172   : > { %v262_v21 = vpop.permute.xlu0 %261 }
 0x173   : > { %v264_v22 = vmul.f32 %v1467_v18, %v262_v21 }
 0x1e3   : > { %v272_v23 = vpop.permute.xlu1 %271 }
 0x1e4   : > { %v274_v24 = vadd.f32 %v272_v23, %v264_v22 }
 0x1e6   : > { %1468 = vtanh.f32 %v274_v24 }
 0x1f0   : > { %v1469_v25 = vpop.eup %1468 }
 0x1f1   : > { %277 = vrot.lane.b32.xlu1 %v1469_v25, %s1537_s23 }
 0x1f5   : > { %282 = vrot.lane.b32.xlu1 %v274_v24, %s1539_s25 }
 0x263   : > { %v278_v26 = vpop.permute.xlu1 %277 }
 0x264   : > { %v280_v27 = vmul.f32 %v1467_v18, %v278_v26 }
 0x266   : > { %287 = vrot.lane.b32.xlu0 %v280_v27, %s1538_s24 }
 0x267   : > { %v283_v28 = vpop.permute.xlu1 %282 }
 0x268   : > { %285 = vst.msk [vmem:[#allocation3] sm:$0x3] %vm164_vm0, %v283_v28 }
 0x26f   : > { %v379_v29 = vld [vmem:[#allocation3] sm:$0x3] }
 0x270   : > { %381 = vrot.lane.b32.xlu1 %v379_v29, %s1538_s24 }
 0x2d8   : > { %v288_v30 = vpop.permute.xlu0 %287 }
 0x2d9   : > { %290 = vst.msk [vmem:[#allocation2] sm:$0x3] %vm164_vm0, %v288_v30  ;;  %292 = vst.msk [vmem:[%s291_s29] sm:$0x3] %vm164_vm0, %v288_v30  ;;  %s1775_s29 = scalar_select %p171_p4, 6, 1 }
 0x2db   : > { %s1261_s30 = sshll.u32 %s1775_s29, 1 }
 0x2dc   : > { %s895_s3 = scalar_lea.vmem %s1613_s20, %s1261_s30  ;;  %s1011_s4 = scalar_lea.vmem %s1632_s28, %s1261_s30 }
 0x2e0   : > { %v297_v31 = vld [vmem:[#allocation2] sm:$0x3] }
 0x2e1   : > { %1332 = vmatmul.mubr.msk.f32.vlgmr.msra.gmra.mrb[0].mxu1 %vm177_vm2, %v297_v31 }
 0x2e2   : > { %1420 = vmatpush3.bf16.msra.mxu1 %v1583_v5  ;;  %1353 = vmatprep.mubr.msk.f32.mxu1 %vm1536_vm1, %v1535_v1  ;;  %v382_v43 = vpop.permute.xlu1 %381 }
 0x2e3   : > { %1421 = vmatprep.subr.bf16.mxu1 %v1534_v0 }
 0x2e6   : > { %1423 = vmatpush3.bf16.msra.mxu1 %v1586_v7 }
 0x2e7   : > { %1430 = vmatprep.subr.bf16.mxu1 %v1534_v0 }
 0x3b4   : > { %v367_v33 = vpop.f32.mrb[0].mxu1 }
 0x3b5   : > { %v371_v34 = vadd.f32 %v367_v33, %v296_v32  ;;  %v1333_v35 = vpop.f32.mrb[1].mxu1 }
 0x3b7   : > { %1470 = vtanh.f32 %v371_v34  ;;  %v1248_v37 = vmul.f32 -1.442695, %v371_v34 }
 0x3b9   : > { %1472 = vpow2.f32 %v1248_v37 }
 0x3c1   : > { %v1471_v36 = vpop.eup %1470 }
 0x3c2   : > { %386 = vrot.lane.b32.xlu0 %v1471_v36, %s1537_s23 }
 0x3c3   : > { %v1473_v38 = vpop.eup %1472 }
 0x3c4   : > { %v375_v39 = vadd.f32 1.0, %v1473_v38  ;;  %v656_v38 = vld [vmem:[%s655_s18] sm:$0x3] }
 0x3c6   : > { %1474 = vrcp.f32 %v375_v39 }
 0x3d0   : > { %v1475_v40 = vpop.eup %1474 }
 0x3d1   : > { %v384_v44 = vmul.f32 %v1475_v40, %v382_v43 }
 0x434   : > { %v387_v41 = vpop.permute.xlu0 %386 }
 0x435   : > { %v389_v42 = vmul.f32 %v1475_v40, %v387_v41 }
 0x437   : > { %391 = vrot.lane.b32.xlu0 %v389_v42, %s1538_s24 }
 0x4a9   : > { %v392_v45 = vpop.permute.xlu0 %391 }
 0x4aa   : > { %v394_v46 = vadd.f32 %v392_v45, %v384_v44 }
 0x4ac   : > { %1476 = vtanh.f32 %v394_v46 }
 0x4b6   : > { %v1477_v47 = vpop.eup %1476 }
 0x4b7   : > { %397 = vrot.lane.b32.xlu1 %v1477_v47, %s1537_s23 }
 0x4bb   : > { %402 = vrot.lane.b32.xlu1 %v394_v46, %s1539_s25 }
 0x529   : > { %v398_v48 = vpop.permute.xlu1 %397 }
 0x52a   : > { %v400_v49 = vmul.f32 %v1475_v40, %v398_v48 }
 0x52c   : > { %407 = vrot.lane.b32.xlu0 %v400_v49, %s1538_s24 }
 0x52d   : > { %v403_v50 = vpop.permute.xlu1 %402 }
 0x52e   : > { %405 = vst.msk [vmem:[#allocation3] sm:$0x3] %vm164_vm0, %v403_v50 }
 0x535   : > { %v499_v51 = vld [vmem:[#allocation3] sm:$0x3] }
 0x536   : > { %501 = vrot.lane.b32.xlu1 %v499_v51, %s1538_s24 }
 0x59e   : > { %v408_v52 = vpop.permute.xlu0 %407 }
 0x59f   : > { %410 = vst.msk [vmem:[#allocation2] sm:$0x3] %vm164_vm0, %v408_v52  ;;  %412 = vst.msk [vmem:[%s411_s5] sm:$0x3] %vm164_vm0, %v408_v52  ;;  %s1796_s5 = scalar_select %p171_p4, 7, 0 }
 0x5a1   : > { %s1264_s6 = sshll.u32 %s1796_s5, 1 }
 0x5a2   : > { %s1015_s7 = scalar_lea.vmem %s1613_s20, %s1264_s6  ;;  %s1131_s10 = scalar_lea.vmem %s1632_s28, %s1264_s6 }
 0x5a6   : > { %v417_v53 = vld [vmem:[#allocation2] sm:$0x3] }
 0x5a7   : > { %1343 = vmatmul.mubr.msk.f32.vlgmr.msra.gmra.mrb[2].mxu0 %vm177_vm2, %v417_v53 }
 0x5a8   : > { %1426 = vmatpush3.bf16.msra.mxu0 %v1583_v5  ;;  %1364 = vmatprep.mubr.msk.f32.mxu0 %vm1536_vm1, %v1535_v1  ;;  %v502_v3 = vpop.permute.xlu1 %501 }
 0x5a9   : > { %1427 = vmatprep.subr.bf16.mxu0 %v1534_v0 }
 0x5ac   : > { %1429 = vmatpush3.bf16.msra.mxu0 %v1586_v7 }
 0x5ad   : > { %1436 = vmatprep.subr.bf16.mxu0 %v1534_v0 }
 0x67a   : > { %v487_v55 = vpop.f32.mrb[2].mxu0 }
 0x67b   : > { %v491_v56 = vadd.f32 %v487_v55, %v416_v54  ;;  %v1344_v57 = vpop.f32.mrb[3].mxu0 }
 0x67d   : > { %1478 = vtanh.f32 %v491_v56  ;;  %v1251_v59 = vmul.f32 -1.442695, %v491_v56 }
 0x67f   : > { %1480 = vpow2.f32 %v1251_v59 }
 0x687   : > { %v1479_v58 = vpop.eup %1478 }
 0x688   : > { %506 = vrot.lane.b32.xlu0 %v1479_v58, %s1537_s23 }
 0x689   : > { %v1481_v60 = vpop.eup %1480 }
 0x68a   : > { %v495_v61 = vadd.f32 1.0, %v1481_v60  ;;  %v776_v60 = vld [vmem:[%s775_s26] sm:$0x3] }
 0x68c   : > { %1482 = vrcp.f32 %v495_v61 }
 0x696   : > { %v1483_v62 = vpop.eup %1482 }
 0x697   : > { %v504_v4 = vmul.f32 %v1483_v62, %v502_v3 }
 0x6fa   : > { %v507_v63 = vpop.permute.xlu0 %506 }
 0x6fb   : > { %v509_v2 = vmul.f32 %v1483_v62, %v507_v63 }
 0x6fd   : > { %511 = vrot.lane.b32.xlu0 %v509_v2, %s1538_s24 }
 0x76f   : > { %v512_v6 = vpop.permute.xlu0 %511 }
 0x770   : > { %v514_v8 = vadd.f32 %v512_v6, %v504_v4 }
 0x772   : > { %1484 = vtanh.f32 %v514_v8 }
 0x77c   : > { %v1485_v9 = vpop.eup %1484 }
 0x77d   : > { %517 = vrot.lane.b32.xlu1 %v1485_v9, %s1537_s23 }
 0x781   : > { %522 = vrot.lane.b32.xlu1 %v514_v8, %s1539_s25 }
 0x7ef   : > { %v518_v10 = vpop.permute.xlu1 %517 }
 0x7f0   : > { %v520_v11 = vmul.f32 %v1483_v62, %v518_v10 }
 0x7f2   : > { %527 = vrot.lane.b32.xlu0 %v520_v11, %s1538_s24 }
 0x7f3   : > { %v523_v12 = vpop.permute.xlu1 %522 }
 0x7f4   : > { %525 = vst.msk [vmem:[#allocation3] sm:$0x3] %vm164_vm0, %v523_v12 }
 0x7fb   : > { %v619_v13 = vld [vmem:[#allocation3] sm:$0x3] }
 0x7fc   : > { %621 = vrot.lane.b32.xlu1 %v619_v13, %s1538_s24 }
 0x864   : > { %v528_v14 = vpop.permute.xlu0 %527 }
 0x865   : > { %530 = vst.msk [vmem:[#allocation2] sm:$0x3] %vm164_vm0, %v528_v14  ;;  %532 = vst.msk [vmem:[%s531_s11] sm:$0x3] %vm164_vm0, %v528_v14 }
 0x86c   : > { %v537_v15 = vld [vmem:[#allocation2] sm:$0x3] }
 0x86d   : > { %1354 = vmatmul.mubr.msk.f32.vlgmr.msra.gmra.mrb[2].mxu1 %vm177_vm2, %v537_v15 }
 0x86e   : > { %1432 = vmatpush3.bf16.msra.mxu1 %v1583_v5  ;;  %1375 = vmatprep.mubr.msk.f32.mxu1 %vm1536_vm1, %v1535_v1  ;;  %v622_v27 = vpop.permute.xlu1 %621 }
 0x86f   : > { %1433 = vmatprep.subr.bf16.mxu1 %v1534_v0 }
 0x872   : > { %1435 = vmatpush3.bf16.msra.mxu1 %v1586_v7 }
 0x873   : > { %1442 = vmatprep.subr.bf16.mxu1 %v1534_v0 }
 0x940   : > { %v607_v17 = vpop.f32.mrb[2].mxu1 }
 0x941   : > { %v611_v18 = vadd.f32 %v607_v17, %v536_v16  ;;  %v1355_v19 = vpop.f32.mrb[3].mxu1 }
 0x943   : > { %1486 = vtanh.f32 %v611_v18  ;;  %v1254_v21 = vmul.f32 -1.442695, %v611_v18  ;;  %v896_v18 = vld [vmem:[%s895_s3] sm:$0x3] }
 0x945   : > { %1488 = vpow2.f32 %v1254_v21 }
 0x94d   : > { %v1487_v20 = vpop.eup %1486 }
 0x94e   : > { %626 = vrot.lane.b32.xlu0 %v1487_v20, %s1537_s23 }
 0x94f   : > { %v1489_v22 = vpop.eup %1488 }
 0x950   : > { %v615_v23 = vadd.f32 1.0, %v1489_v22 }
 0x952   : > { %1490 = vrcp.f32 %v615_v23 }
 0x95c   : > { %v1491_v24 = vpop.eup %1490 }
 0x95d   : > { %v624_v28 = vmul.f32 %v1491_v24, %v622_v27 }
 0x9c0   : > { %v627_v25 = vpop.permute.xlu0 %626 }
 0x9c1   : > { %v629_v26 = vmul.f32 %v1491_v24, %v627_v25 }
 0x9c3   : > { %631 = vrot.lane.b32.xlu0 %v629_v26, %s1538_s24 }
 0xa35   : > { %v632_v29 = vpop.permute.xlu0 %631 }
 0xa36   : > { %v634_v30 = vadd.f32 %v632_v29, %v624_v28 }
 0xa38   : > { %1492 = vtanh.f32 %v634_v30 }
 0xa42   : > { %v1493_v31 = vpop.eup %1492 }
 0xa43   : > { %637 = vrot.lane.b32.xlu1 %v1493_v31, %s1537_s23 }
 0xa47   : > { %642 = vrot.lane.b32.xlu1 %v634_v30, %s1539_s25 }
 0xab5   : > { %v638_v32 = vpop.permute.xlu1 %637 }
 0xab6   : > { %v640_v33 = vmul.f32 %v1491_v24, %v638_v32 }
 0xab8   : > { %647 = vrot.lane.b32.xlu0 %v640_v33, %s1538_s24 }
 0xab9   : > { %v643_v34 = vpop.permute.xlu1 %642 }
 0xaba   : > { %645 = vst.msk [vmem:[#allocation3] sm:$0x3] %vm164_vm0, %v643_v34 }
 0xac1   : > { %v739_v35 = vld [vmem:[#allocation3] sm:$0x3] }
 0xac2   : > { %741 = vrot.lane.b32.xlu1 %v739_v35, %s1538_s24 }
 0xb2a   : > { %v648_v36 = vpop.permute.xlu0 %647 }
 0xb2b   : > { %650 = vst.msk [vmem:[#allocation2] sm:$0x3] %vm164_vm0, %v648_v36  ;;  %652 = vst.msk [vmem:[%s651_s15] sm:$0x3] %vm164_vm0, %v648_v36 }
 0xb32   : > { %v657_v37 = vld [vmem:[#allocation2] sm:$0x3] }
 0xb33   : > { %1365 = vmatmul.mubr.msk.f32.vlgmr.msra.gmra.mrb[4].mxu0 %vm177_vm2, %v657_v37 }
 0xb34   : > { %1438 = vmatpush3.bf16.msra.mxu0 %v1583_v5  ;;  %1386 = vmatprep.mubr.msk.f32.mxu0 %vm1536_vm1, %v1535_v1  ;;  %v742_v49 = vpop.permute.xlu1 %741 }
 0xb35   : > { %1439 = vmatprep.subr.bf16.mxu0 %v1534_v0 }
 0xb38   : > { %1441 = vmatpush3.bf16.msra.mxu0 %v1586_v7 }
 0xc06   : > { %v727_v39 = vpop.f32.mrb[4].mxu0 }
 0xc07   : > { %v731_v40 = vadd.f32 %v727_v39, %v656_v38  ;;  %v1366_v41 = vpop.f32.mrb[5].mxu0 }
 0xc09   : > { %1494 = vtanh.f32 %v731_v40  ;;  %v1257_v43 = vmul.f32 -1.442695, %v731_v40  ;;  %v1016_v40 = vld [vmem:[%s1015_s7] sm:$0x3] }
 0xc0b   : > { %1496 = vpow2.f32 %v1257_v43 }
 0xc13   : > { %v1495_v42 = vpop.eup %1494 }
 0xc14   : > { %746 = vrot.lane.b32.xlu0 %v1495_v42, %s1537_s23 }
 0xc15   : > { %v1497_v44 = vpop.eup %1496 }
 0xc16   : > { %v735_v45 = vadd.f32 1.0, %v1497_v44 }
 0xc18   : > { %1498 = vrcp.f32 %v735_v45 }
 0xc22   : > { %v1499_v46 = vpop.eup %1498 }
 0xc23   : > { %v744_v50 = vmul.f32 %v1499_v46, %v742_v49 }
 0xc86   : > { %v747_v47 = vpop.permute.xlu0 %746 }
 0xc87   : > { %v749_v48 = vmul.f32 %v1499_v46, %v747_v47 }
 0xc89   : > { %751 = vrot.lane.b32.xlu0 %v749_v48, %s1538_s24 }
 0xcfb   : > { %v752_v51 = vpop.permute.xlu0 %751 }
 0xcfc   : > { %v754_v52 = vadd.f32 %v752_v51, %v744_v50 }
 0xcfe   : > { %1500 = vtanh.f32 %v754_v52 }
 0xd08   : > { %v1501_v53 = vpop.eup %1500 }
 0xd09   : > { %757 = vrot.lane.b32.xlu1 %v1501_v53, %s1537_s23 }
 0xd0d   : > { %762 = vrot.lane.b32.xlu1 %v754_v52, %s1539_s25 }
 0xd7b   : > { %v758_v54 = vpop.permute.xlu1 %757 }
 0xd7c   : > { %v760_v55 = vmul.f32 %v1499_v46, %v758_v54 }
 0xd7e   : > { %767 = vrot.lane.b32.xlu0 %v760_v55, %s1538_s24 }
 0xd7f   : > { %v763_v56 = vpop.permute.xlu1 %762 }
 0xd80   : > { %765 = vst.msk [vmem:[#allocation3] sm:$0x3] %vm164_vm0, %v763_v56 }
 0xd87   : > { %v859_v57 = vld [vmem:[#allocation3] sm:$0x3] }
 0xd88   : > { %861 = vrot.lane.b32.xlu1 %v859_v57, %s1538_s24 }
 0xdf0   : > { %v768_v58 = vpop.permute.xlu0 %767 }
 0xdf1   : > { %770 = vst.msk [vmem:[#allocation2] sm:$0x3] %vm164_vm0, %v768_v58  ;;  %772 = vst.msk [vmem:[%s771_s19] sm:$0x3] %vm164_vm0, %v768_v58 }
 0xdf8   : > { %v777_v59 = vld [vmem:[#allocation2] sm:$0x3] }
 0xdf9   : > { %1376 = vmatmul.mubr.msk.f32.vlgmr.msra.gmra.mrb[4].mxu1 %vm177_vm2, %v777_v59 }
 0xdfa   : > { %1444 = vmatpush3.bf16.msra.mxu1 %v1583_v5  ;;  %1397 = vmatprep.mubr.msk.f32.mxu1 %vm1536_vm1, %v1535_v1  ;;  %v862_v6 = vpop.permute.xlu1 %861 }
 0xdfb   : > { %1445 = vmatprep.subr.bf16.mxu1 %v1534_v0 }
 0xdfe   : > { %1447 = vmatpush3.bf16.msra.mxu1 %v1586_v7 }
 0xecc   : > { %v847_v61 = vpop.f32.mrb[4].mxu1 }
 0xecd   : > { %v851_v62 = vadd.f32 %v847_v61, %v776_v60  ;;  %v1377_v63 = vpop.f32.mrb[5].mxu1 }
 0xecf   : > { %1502 = vtanh.f32 %v851_v62  ;;  %v1260_v1 = vmul.f32 -1.442695, %v851_v62 }
 0xed1   : > { %1504 = vpow2.f32 %v1260_v1 }
 0xed9   : > { %v1503_v5 = vpop.eup %1502 }
 0xeda   : > { %866 = vrot.lane.b32.xlu0 %v1503_v5, %s1537_s23 }
 0xedb   : > { %v1505_v0 = vpop.eup %1504 }
 0xedc   : > { %v855_v7 = vadd.f32 1.0, %v1505_v0 }
 0xede   : > { %1506 = vrcp.f32 %v855_v7 }
 0xee8   : > { %v1507_v2 = vpop.eup %1506 }
 0xee9   : > { %v864_v8 = vmul.f32 %v1507_v2, %v862_v6 }
 0xf4c   : > { %v867_v3 = vpop.permute.xlu0 %866 }
 0xf4d   : > { %v869_v4 = vmul.f32 %v1507_v2, %v867_v3 }
 0xf4f   : > { %871 = vrot.lane.b32.xlu0 %v869_v4, %s1538_s24 }
 0xfc1   : > { %v872_v9 = vpop.permute.xlu0 %871 }
 0xfc2   : > { %v874_v10 = vadd.f32 %v872_v9, %v864_v8 }
 0xfc4   : > { %1508 = vtanh.f32 %v874_v10 }
 0xfce   : > { %v1509_v11 = vpop.eup %1508 }
 0xfcf   : > { %877 = vrot.lane.b32.xlu1 %v1509_v11, %s1537_s23 }
 0xfd3   : > { %882 = vrot.lane.b32.xlu1 %v874_v10, %s1539_s25 }
0x1041   : > { %v878_v12 = vpop.permute.xlu1 %877 }
0x1042   : > { %v880_v13 = vmul.f32 %v1507_v2, %v878_v12 }
0x1044   : > { %887 = vrot.lane.b32.xlu0 %v880_v13, %s1538_s24 }
0x1045   : > { %v883_v14 = vpop.permute.xlu1 %882 }
0x1046   : > { %885 = vst.msk [vmem:[#allocation3] sm:$0x3] %vm164_vm0, %v883_v14 }
0x104d   : > { %v979_v15 = vld [vmem:[#allocation3] sm:$0x3] }
0x104e   : > { %981 = vrot.lane.b32.xlu1 %v979_v15, %s1538_s24 }
0x10b6   : > { %v888_v16 = vpop.permute.xlu0 %887 }
0x10b7   : > { %890 = vst.msk [vmem:[#allocation2] sm:$0x3] %vm164_vm0, %v888_v16  ;;  %892 = vst.msk [vmem:[%s891_s27] sm:$0x3] %vm164_vm0, %v888_v16 }
0x10be   : > { %v897_v17 = vld [vmem:[#allocation2] sm:$0x3] }
0x10bf   : > { %1387 = vmatmul.mubr.msk.f32.vlgmr.msra.gmra.mrb[6].mxu0 %vm177_vm2, %v897_v17 }
0x10c0   : > { %v982_v29 = vpop.permute.xlu1 %981 }
0x1192   : > { %v967_v19 = vpop.f32.mrb[6].mxu0 }
0x1193   : > { %v971_v20 = vadd.f32 %v967_v19, %v896_v18  ;;  %v1388_v21 = vpop.f32.mrb[7].mxu0 }
0x1195   : > { %1510 = vtanh.f32 %v971_v20  ;;  %v1263_v23 = vmul.f32 -1.442695, %v971_v20 }
0x1197   : > { %1512 = vpow2.f32 %v1263_v23 }
0x119f   : > { %v1511_v22 = vpop.eup %1510 }
0x11a0   : > { %986 = vrot.lane.b32.xlu0 %v1511_v22, %s1537_s23 }
0x11a1   : > { %v1513_v24 = vpop.eup %1512 }
0x11a2   : > { %v975_v25 = vadd.f32 1.0, %v1513_v24 }
0x11a4   : > { %1514 = vrcp.f32 %v975_v25 }
0x11ae   : > { %v1515_v26 = vpop.eup %1514 }
0x11af   : > { %v984_v30 = vmul.f32 %v1515_v26, %v982_v29 }
0x1212   : > { %v987_v27 = vpop.permute.xlu0 %986 }
0x1213   : > { %v989_v28 = vmul.f32 %v1515_v26, %v987_v27 }
0x1215   : > { %991 = vrot.lane.b32.xlu0 %v989_v28, %s1538_s24 }
0x1287   : > { %v992_v31 = vpop.permute.xlu0 %991 }
0x1288   : > { %v994_v32 = vadd.f32 %v992_v31, %v984_v30 }
0x128a   : > { %1516 = vtanh.f32 %v994_v32 }
0x1294   : > { %v1517_v33 = vpop.eup %1516 }
0x1295   : > { %997 = vrot.lane.b32.xlu1 %v1517_v33, %s1537_s23 }
0x1299   : > { %1002 = vrot.lane.b32.xlu1 %v994_v32, %s1539_s25 }
0x1307   : > { %v998_v34 = vpop.permute.xlu1 %997 }
0x1308   : > { %v1000_v35 = vmul.f32 %v1515_v26, %v998_v34 }
0x130a   : > { %1007 = vrot.lane.b32.xlu0 %v1000_v35, %s1538_s24 }
0x130b   : > { %v1003_v36 = vpop.permute.xlu1 %1002 }
0x130c   : > { %1005 = vst.msk [vmem:[#allocation3] sm:$0x3] %vm164_vm0, %v1003_v36 }
0x1313   : > { %v1099_v37 = vld [vmem:[#allocation3] sm:$0x3] }
0x1314   : > { %1101 = vrot.lane.b32.xlu1 %v1099_v37, %s1538_s24 }
0x137c   : > { %v1008_v38 = vpop.permute.xlu0 %1007 }
0x137d   : > { %1010 = vst.msk [vmem:[#allocation2] sm:$0x3] %vm164_vm0, %v1008_v38  ;;  %1012 = vst.msk [vmem:[%s1011_s4] sm:$0x3] %vm164_vm0, %v1008_v38 }
0x1384   : > { %v1017_v39 = vld [vmem:[#allocation2] sm:$0x3] }
0x1385   : > { %1398 = vmatmul.mubr.msk.f32.vlgmr.msra.gmra.mrb[6].mxu1 %vm177_vm2, %v1017_v39 }
0x1386   : > { %v1102_v51 = vpop.permute.xlu1 %1101 }
0x1458   : > { %v1087_v41 = vpop.f32.mrb[6].mxu1 }
0x1459   : > { %v1091_v42 = vadd.f32 %v1087_v41, %v1016_v40  ;;  %v1399_v43 = vpop.f32.mrb[7].mxu1 }
0x145b   : > { %1518 = vtanh.f32 %v1091_v42  ;;  %v1266_v45 = vmul.f32 -1.442695, %v1091_v42 }
0x145d   : > { %1520 = vpow2.f32 %v1266_v45 }
0x1465   : > { %v1519_v44 = vpop.eup %1518 }
0x1466   : > { %1106 = vrot.lane.b32.xlu0 %v1519_v44, %s1537_s23 }
0x1467   : > { %v1521_v46 = vpop.eup %1520 }
0x1468   : > { %v1095_v47 = vadd.f32 1.0, %v1521_v46 }
0x146a   : > { %1522 = vrcp.f32 %v1095_v47 }
0x1474   : > { %v1523_v48 = vpop.eup %1522 }
0x1475   : > { %v1104_v52 = vmul.f32 %v1523_v48, %v1102_v51 }
0x14d8   : > { %v1107_v49 = vpop.permute.xlu0 %1106 }
0x14d9   : > { %v1109_v50 = vmul.f32 %v1523_v48, %v1107_v49 }
0x14db   : > { %1111 = vrot.lane.b32.xlu0 %v1109_v50, %s1538_s24 }
0x154d   : > { %v1112_v53 = vpop.permute.xlu0 %1111 }
0x154e   : > { %v1114_v54 = vadd.f32 %v1112_v53, %v1104_v52 }
0x1550   : > { %1524 = vtanh.f32 %v1114_v54  ;;  %1122 = vrot.lane.b32.xlu0 %v1114_v54, %s1539_s25 }
0x155a   : > { %v1525_v55 = vpop.eup %1524 }
0x155b   : > { %1117 = vrot.lane.b32.xlu1 %v1525_v55, %s1537_s23 }
0x15c2   : > { %v1123_v56 = vpop.permute.xlu0 %1122 }
0x15c3   : > { %1125 = vst.msk [vmem:[#allocation3] sm:$0x3] %vm164_vm0, %v1123_v56 }
0x15cd   : > { %v1118_v57 = vpop.permute.xlu1 %1117 }
0x15ce   : > { %v1120_v58 = vmul.f32 %v1523_v48, %v1118_v57 }
0x15d0   : > { %1127 = vrot.lane.b32.xlu1 %v1120_v58, %s1538_s24 }
0x1642   : > { %v1128_v59 = vpop.permute.xlu1 %1127 }
0x1643   : > { %1130 = vst.msk [vmem:[#allocation2] sm:$0x3] %vm164_vm0, %v1128_v59  ;;  %1132 = vst.msk [vmem:[%s1131_s10] sm:$0x3] %vm164_vm0, %v1128_v59 }
0x1644 PF: > { %s12_s9 = sadd.s32 1, %s1532_s9  }
0x1645   : > { %p9_p5 = scmp.ge.s32.totalorder %s12_s9, 4  }
0x1647   :  { %11 = sbr.rel (!%p9_p5) target bundleno = 1 (0x1), region = 77 }

</bundles_post_ra>
